<compile_context>
chip_gen: v7x
topology: tpu7x:2x2x1
jax: 0.10.0
libtpu: 0.0.40
codegen_flags: <defaults>
</compile_context>

<pallas_src>
import functools

import jax
import jax.numpy as jnp
from jax import lax
from jax.experimental import pallas as pl
from jax.experimental.pallas import tpu as pltpu

KD = 3            # dilated conv kernel size
DIL = 4           # dilation
PADD = 4          # padding of the dilated convs (== DIL in this module)
N_DIL_LAYERS = 2  # dilation_conv_num
BN_EPS = 1e-5


def _bam_kernel(H, W,
                x_ref, w1t_ref, b1_ref, w2_ref, b2_ref,
                w0_ref, b0_ref, wd_ref, bd_ref, wf_ref, bf_ref,
                o_ref,
                pad_ref):
    """One batch item per grid step.  x_ref: (1, C, H*W) lane-dense."""
    C, HW = x_ref.shape[1], x_ref.shape[2]
    Cr = w0_ref.shape[0]
    HALO = DIL * W + DIL                      # max |flat shift| of a dilated tap
    inv_hw = 1.0 / float(HW)
    f32 = jnp.float32

    x2d = x_ref[0]                                                     # (C, HW)

    # ---------------- ChannelGate: GAP -> Linear(+BN)+ReLU -> Linear ----------
    avg = jnp.sum(x2d, axis=-1, keepdims=True) * inv_hw                # (C, 1)
    h = jnp.sum(w1t_ref[...] * avg, axis=0, keepdims=True) + b1_ref[...]   # (1, Cr)
    h = jnp.maximum(h, 0.0)
    ca = jnp.sum(w2_ref[...] * h, axis=1, keepdims=True) + b2_ref[...]     # (C, 1)

    # ---------------- SpatialGate: 1x1 reduce (MXU) ---------------------------
    y = jnp.dot(w0_ref[...], x2d,
                preferred_element_type=f32,
                precision=lax.Precision.HIGHEST) + b0_ref[...]         # (Cr, HW)
    y = jnp.maximum(y, 0.0)

    # ---------------- two dilated 3x3 convs (dil=4, pad=4, BN folded, ReLU) ---
    # Flat zero-halo buffer: pad_ref[:, HALO + f] == y[:, f]; anything outside
    # [0, HW) lands in a zero strip.  A dilated tap (dy, dx) is then simply the
    # slice at flat offset dy*W + dx; wrap-around across image rows (dx != 0)
    # is cancelled by a static per-column mask.
    pad_ref[...] = jnp.zeros(pad_ref.shape, f32)
    col = lax.broadcasted_iota(jnp.int32, (1, HW), 1) % W              # (1, HW)

    for l in range(N_DIL_LAYERS):
        pad_ref[:, HALO:HALO + HW] = y
        taps = []
        for ky in range(KD):
            for kx in range(KD):
                dy = (ky - 1) * DIL
                dx = (kx - 1) * DIL
                off = dy * W + dx
                sh = pad_ref[:, HALO + off:HALO + off + HW]            # (Cr, HW)
                if dx != 0:
                    valid = jnp.logical_and(col + dx >= 0, col + dx < W)
                    sh = jnp.where(valid, sh, 0.0)
                taps.append(sh)
        stacked = jnp.concatenate(taps, axis=0)                        # (9*Cr, HW)
        y = jnp.dot(wd_ref[l], stacked,
                    preferred_element_type=f32,
                    precision=lax.Precision.HIGHEST) + bd_ref[l]       # (Cr, HW)
        y = jnp.maximum(y, 0.0)

    # final 1x1 conv: Cr -> 1 (tiny contraction -> cross-sublane reduce)
    sa = jnp.sum(wf_ref[...] * y, axis=0, keepdims=True) + bf_ref[...]  # (1, HW)

    # ---------------- att = sigmoid(channel_att * spatial_att) ----------------
    o_ref[0] = jax.nn.sigmoid(ca * sa).astype(o_ref.dtype)             # (C, HW)


def _fold_bn_linear(w, b, g, beta, rm, rv, eps=BN_EPS):
    s = g * jax.lax.rsqrt(rv + eps)
    return w * s[:, None], (b - rm) * s + beta


def _fold_bn_conv(w, b, g, beta, rm, rv, eps=BN_EPS):
    s = g * jax.lax.rsqrt(rv + eps)
    return w * s[:, None, None, None], (b - rm) * s + beta


@jax.jit
def bam_forward(x, p):
    """x: (N, C, H, W) f32.  p: dict of raw (unfolded) BAM parameters."""
    N, C, H, W = x.shape
    HW = H * W
    Cr = p['fc1_w'].shape[0]
    f32 = jnp.float32

    # Fold eval-mode BatchNorm into the preceding Linear / Conv.
    w1f, b1f = _fold_bn_linear(p['fc1_w'], p['fc1_b'],
                               p['bn1_g'], p['bn1_b'], p['bn1_rm'], p['bn1_rv'])
    w0f, b0f = _fold_bn_conv(p['conv0_w'], p['conv0_b'],
                             p['bn_s0_g'], p['bn_s0_b'], p['bn_s0_rm'], p['bn_s0_rv'])
    wd0, bd0 = _fold_bn_conv(p['convd0_w'], p['convd0_b'],
                             p['bn_d0_g'], p['bn_d0_b'], p['bn_d0_rm'], p['bn_d0_rv'])
    wd1, bd1 = _fold_bn_conv(p['convd1_w'], p['convd1_b'],
                             p['bn_d1_g'], p['bn_d1_b'], p['bn_d1_rm'], p['bn_d1_rv'])

    w1t = w1f.T.astype(f32)                              # (C, Cr)
    b1 = b1f.reshape(1, Cr).astype(f32)                  # (1, Cr)
    w2 = p['fc2_w'].astype(f32)                          # (C, Cr)
    b2 = p['fc2_b'].reshape(C, 1).astype(f32)            # (C, 1)
    w0 = w0f.reshape(Cr, C).astype(f32)                  # (Cr, C)
    b0 = b0f.reshape(Cr, 1).astype(f32)                  # (Cr, 1)

    # Dilated-conv weights rearranged for the per-layer (Cr, 9*Cr)@(9*Cr, HW)
    # matmul; row order of the stacked operand is (tap-major, ci-minor).
    def _rearrange(w):                                   # (Cr, Cr, 3, 3) -> (Cr, 9*Cr)
        return jnp.transpose(w, (0, 2, 3, 1)).reshape(Cr, KD * KD * Cr)

    wd = jnp.stack([_rearrange(wd0), _rearrange(wd1)], axis=0).astype(f32)   # (2, Cr, 9Cr)
    bd = jnp.stack([bd0.reshape(Cr, 1), bd1.reshape(Cr, 1)], axis=0).astype(f32)  # (2, Cr, 1)
    wf = p['convf_w'].reshape(Cr, 1).astype(f32)         # (Cr, 1)
    bf = p['convf_b'].reshape(1, 1).astype(f32)          # (1, 1)

    x_flat = x.astype(f32).reshape(N, C, HW)             # lane-dense layout

    flops = N * HW * (C                                   # GAP
                      + 2 * Cr * C                        # 1x1 reduce
                      + N_DIL_LAYERS * 2 * Cr * KD * KD * Cr   # dilated convs
                      + 2 * Cr                            # final 1x1
                      + 2 * C)                            # ca*sa + sigmoid misc
    cost = pl.CostEstimate(flops=flops,
                           transcendentals=N * C * HW,
                           bytes_accessed=4 * 2 * N * C * HW)

    halo = DIL * W + DIL
    kernel = functools.partial(_bam_kernel, H, W)

    out_flat = pl.pallas_call(
        kernel,
        out_shape=jax.ShapeDtypeStruct((N, C, HW), f32),
        grid=(N,),
        in_specs=[
            pl.BlockSpec((1, C, HW), lambda n: (n, 0, 0)),                    # x (lane-dense)
            pl.BlockSpec((C, Cr), lambda n: (0, 0)),                          # w1t (fc1, BN folded, transposed)
            pl.BlockSpec((1, Cr), lambda n: (0, 0)),                          # b1
            pl.BlockSpec((C, Cr), lambda n: (0, 0)),                          # w2  (fc2)
            pl.BlockSpec((C, 1), lambda n: (0, 0)),                           # b2
            pl.BlockSpec((Cr, C), lambda n: (0, 0)),                          # w0  (1x1 reduce, folded)
            pl.BlockSpec((Cr, 1), lambda n: (0, 0)),                          # b0
            pl.BlockSpec((N_DIL_LAYERS, Cr, KD * KD * Cr), lambda n: (0, 0, 0)),  # wd
            pl.BlockSpec((N_DIL_LAYERS, Cr, 1), lambda n: (0, 0, 0)),         # bd
            pl.BlockSpec((Cr, 1), lambda n: (0, 0)),                          # wf  (final 1x1)
            pl.BlockSpec((1, 1), lambda n: (0, 0)),                           # bf
        ],
        out_specs=pl.BlockSpec((1, C, HW), lambda n: (n, 0, 0)),
        scratch_shapes=[
            pltpu.VMEM((Cr, HW + 2 * halo), f32),   # flat zero-halo activation buffer
        ],
        compiler_params=pltpu.CompilerParams(
            dimension_semantics=("parallel",),
            vmem_limit_bytes=32 * 1024 * 1024),
        cost_estimate=cost,
    )(x_flat, w1t, b1, w2, b2, w0, b0, wd, bd, wf, bf)

    return out_flat.reshape(N, C, H, W)


def _reference(x, p, eps=BN_EPS):
    """Pure-JAX reference matching the PyTorch BAM forward (BN in eval mode)."""
    # ChannelGate (H == W, so avg_pool2d(kernel=H, stride=H) == global mean)
    avg = jnp.mean(x, axis=(2, 3))                                   # (N, C)
    z = avg @ p['fc1_w'].T + p['fc1_b']
    z = (p['bn1_g'] * (z - p['bn1_rm']) * jax.lax.rsqrt(p['bn1_rv'] + eps)
         + p['bn1_b'])
    z = jnp.maximum(z, 0.0)
    ca = (z @ p['fc2_w'].T + p['fc2_b'])[:, :, None, None]           # (N, C, 1, 1)

    def conv(y, w, pad, dil):
        return jax.lax.conv_general_dilated(
            y, w, (1, 1), padding=((pad, pad), (pad, pad)),
            rhs_dilation=(dil, dil),
            dimension_numbers=("NCHW", "OIHW", "NCHW"))

    def bn2d(y, g, b, rm, rv):
        return (g[None, :, None, None] * (y - rm[None, :, None, None])
                * jax.lax.rsqrt(rv + eps)[None, :, None, None]
                + b[None, :, None, None])

    y = conv(x, p['conv0_w'], 0, 1) + p['conv0_b'][None, :, None, None]
    y = jnp.maximum(bn2d(y, p['bn_s0_g'], p['bn_s0_b'], p['bn_s0_rm'], p['bn_s0_rv']), 0.0)
    for l in range(N_DIL_LAYERS):
        y = conv(y, p[f'convd{l}_w'], PADD, DIL) + p[f'convd{l}_b'][None, :, None, None]
        y = jnp.maximum(
            bn2d(y, p[f'bn_d{l}_g'], p[f'bn_d{l}_b'], p[f'bn_d{l}_rm'], p[f'bn_d{l}_rv']),
            0.0)
    sa = conv(y, p['convf_w'], 0, 1) + p['convf_b'][None, :, None, None]   # (N,1,H,W)
    return jax.nn.sigmoid(ca * sa)                                         # (N,C,H,W)


if __name__ == "__main__":
    # gate_channel must be >= reduction_ratio (16) for the module to be valid.
    N, C, H, W = 2, 32, 16, 16
    Cr = C // 16

    key = jax.random.PRNGKey(0)
    keys = iter(jax.random.split(key, 40))

    def u(shape, bound):
        return jax.random.uniform(next(keys), shape, jnp.float32, -bound, bound)

    def pos(shape):
        return jax.random.uniform(next(keys), shape, jnp.float32, 0.5, 1.5)

    x = jax.random.normal(next(keys), (N, C, H, W), dtype=jnp.float32)

    b_c = 1.0 / (C ** 0.5)
    b_r = 1.0 / (Cr ** 0.5)
    b_d = 1.0 / ((Cr * KD * KD) ** 0.5)

    p = {
        # ChannelGate
        'fc1_w': u((Cr, C), b_c), 'fc1_b': u((Cr,), b_c),
        'bn1_g': pos((Cr,)), 'bn1_b': u((Cr,), 0.3),
        'bn1_rm': u((Cr,), 0.3), 'bn1_rv': pos((Cr,)),
        'fc2_w': u((C, Cr), b_r), 'fc2_b': u((C,), b_r),
        # SpatialGate: 1x1 reduce
        'conv0_w': u((Cr, C, 1, 1), b_c), 'conv0_b': u((Cr,), b_c),
        'bn_s0_g': pos((Cr,)), 'bn_s0_b': u((Cr,), 0.3),
        'bn_s0_rm': u((Cr,), 0.3), 'bn_s0_rv': pos((Cr,)),
        # final 1x1
        'convf_w': u((1, Cr, 1, 1), b_r), 'convf_b': u((1,), b_r),
    }
    for l in range(N_DIL_LAYERS):
        p[f'convd{l}_w'] = u((Cr, Cr, KD, KD), b_d)
        p[f'convd{l}_b'] = u((Cr,), b_d)
        p[f'bn_d{l}_g'] = pos((Cr,))
        p[f'bn_d{l}_b'] = u((Cr,), 0.3)
        p[f'bn_d{l}_rm'] = u((Cr,), 0.3)
        p[f'bn_d{l}_rv'] = pos((Cr,))

    out = bam_forward(x, p)
    out = jax.block_until_ready(out)

    ref = _reference(x, p)
    assert out.shape == (N, C, H, W), out.shape
    err = float(jnp.max(jnp.abs(out - ref)))
    assert jnp.allclose(out, ref, atol=5e-5, rtol=5e-5), err

    print("KERNEL_OK")
</pallas_src>

<mosaic_0001>
module attributes {stable_mosaic.version = 11 : i64} {
  func.func @_bam_kernel(%arg0: i32, %arg1: memref<1x32x256xf32, #tpu.memory_space<vmem>>, %arg2: memref<32x2xf32, #tpu.memory_space<vmem>>, %arg3: memref<1x2xf32, #tpu.memory_space<vmem>>, %arg4: memref<32x2xf32, #tpu.memory_space<vmem>>, %arg5: memref<32x1xf32, #tpu.memory_space<vmem>>, %arg6: memref<2x32xf32, #tpu.memory_space<vmem>>, %arg7: memref<2x1xf32, #tpu.memory_space<vmem>>, %arg8: memref<2x2x18xf32, #tpu.memory_space<vmem>>, %arg9: memref<2x2x1xf32, #tpu.memory_space<vmem>>, %arg10: memref<2x1xf32, #tpu.memory_space<vmem>>, %arg11: memref<1x1xf32, #tpu.memory_space<vmem>>, %arg12: memref<1x32x256xf32, #tpu.memory_space<vmem>>, %arg13: memref<2x392xf32, #tpu.memory_space<vmem>>) attributes {dimension_semantics = [#tpu.dimension_semantics<parallel>], iteration_bounds = array<i64: 2>, scalar_prefetch = 0 : i64, scratch_operands = 1 : i64, tpu.core_type = #tpu.core_type<tc>, window_params = [{transform_indices = @transform_0, window_bounds = array<i64: 1, 32, 256>}, {pipeline_mode = #tpu.pipeline_mode<synchronous>, transform_indices = @transform_1, window_bounds = array<i64: 32, 2>}, {pipeline_mode = #tpu.pipeline_mode<synchronous>, transform_indices = @transform_2, window_bounds = array<i64: 1, 2>}, {pipeline_mode = #tpu.pipeline_mode<synchronous>, transform_indices = @transform_3, window_bounds = array<i64: 32, 2>}, {pipeline_mode = #tpu.pipeline_mode<synchronous>, transform_indices = @transform_4, window_bounds = array<i64: 32, 1>}, {pipeline_mode = #tpu.pipeline_mode<synchronous>, transform_indices = @transform_5, window_bounds = array<i64: 2, 32>}, {pipeline_mode = #tpu.pipeline_mode<synchronous>, transform_indices = @transform_6, window_bounds = array<i64: 2, 1>}, {pipeline_mode = #tpu.pipeline_mode<synchronous>, transform_indices = @transform_7, window_bounds = array<i64: 2, 2, 18>}, {pipeline_mode = #tpu.pipeline_mode<synchronous>, transform_indices = @transform_8, window_bounds = array<i64: 2, 2, 1>}, {pipeline_mode = #tpu.pipeline_mode<synchronous>, transform_indices = @transform_9, window_bounds = array<i64: 2, 1>}, {pipeline_mode = #tpu.pipeline_mode<synchronous>, transform_indices = @transform_10, window_bounds = array<i64: 1, 1>}, {transform_indices = @transform_11, window_bounds = array<i64: 1, 32, 256>}]} {
    %c0 = arith.constant 0 : index
    %c0_0 = arith.constant 0 : index
    %c0_1 = arith.constant 0 : index
    %0 = vector.load %arg1[%c0, %c0_0, %c0_1] : memref<1x32x256xf32, #tpu.memory_space<vmem>>, vector<1x32x256xf32>
    %1 = vector.shape_cast %0 : vector<1x32x256xf32> to vector<32x256xf32>
    %cst = arith.constant dense<0.000000e+00> : vector<32xf32>
    %2 = vector.multi_reduction <add>, %1, %cst [1] : vector<32x256xf32> to vector<32xf32>
    %3 = vector.shape_cast %2 : vector<32xf32> to vector<32x1xf32>
    %cst_2 = arith.constant 3.906250e-03 : f32
    %4 = vector.broadcast %cst_2 : f32 to vector<32x1xf32>
    %5 = arith.mulf %3, %4 : vector<32x1xf32>
    %c0_3 = arith.constant 0 : index
    %c0_4 = arith.constant 0 : index
    %6 = vector.load %arg2[%c0_3, %c0_4] : memref<32x2xf32, #tpu.memory_space<vmem>>, vector<32x2xf32>
    %7 = vector.broadcast %5 : vector<32x1xf32> to vector<32x2xf32>
    %8 = arith.mulf %6, %7 : vector<32x2xf32>
    %cst_5 = arith.constant dense<0.000000e+00> : vector<2xf32>
    %9 = vector.multi_reduction <add>, %8, %cst_5 [0] : vector<32x2xf32> to vector<2xf32>
    %10 = vector.shape_cast %9 : vector<2xf32> to vector<1x2xf32>
    %c0_6 = arith.constant 0 : index
    %c0_7 = arith.constant 0 : index
    %11 = vector.load %arg3[%c0_6, %c0_7] : memref<1x2xf32, #tpu.memory_space<vmem>>, vector<1x2xf32>
    %12 = arith.addf %10, %11 : vector<1x2xf32>
    %cst_8 = arith.constant 0.000000e+00 : f32
    %13 = vector.broadcast %cst_8 : f32 to vector<1x2xf32>
    %14 = arith.maximumf %12, %13 : vector<1x2xf32>
    %c0_9 = arith.constant 0 : index
    %c0_10 = arith.constant 0 : index
    %15 = vector.load %arg4[%c0_9, %c0_10] : memref<32x2xf32, #tpu.memory_space<vmem>>, vector<32x2xf32>
    %16 = vector.broadcast %14 : vector<1x2xf32> to vector<32x2xf32>
    %17 = arith.mulf %15, %16 : vector<32x2xf32>
    %cst_11 = arith.constant dense<0.000000e+00> : vector<32xf32>
    %18 = vector.multi_reduction <add>, %17, %cst_11 [1] : vector<32x2xf32> to vector<32xf32>
    %19 = vector.shape_cast %18 : vector<32xf32> to vector<32x1xf32>
    %c0_12 = arith.constant 0 : index
    %c0_13 = arith.constant 0 : index
    %20 = vector.load %arg5[%c0_12, %c0_13] : memref<32x1xf32, #tpu.memory_space<vmem>>, vector<32x1xf32>
    %21 = arith.addf %19, %20 : vector<32x1xf32>
    %c0_14 = arith.constant 0 : index
    %c0_15 = arith.constant 0 : index
    %22 = vector.load %arg6[%c0_14, %c0_15] : memref<2x32xf32, #tpu.memory_space<vmem>>, vector<2x32xf32>
    %cst_16 = arith.constant dense<0.000000e+00> : vector<2x256xf32>
    %23 = tpu.matmul %22, %1, %cst_16 {dimension_numbers = #tpu.dot_dimension_numbers<[1], [0], [0], [1], [0, 0, 1, 1], [], []>, precision = #tpu.contract_precision<fp32>} : vector<2x32xf32>, vector<32x256xf32>, vector<2x256xf32> -> vector<2x256xf32>
    %c0_17 = arith.constant 0 : index
    %c0_18 = arith.constant 0 : index
    %24 = vector.load %arg7[%c0_17, %c0_18] : memref<2x1xf32, #tpu.memory_space<vmem>>, vector<2x1xf32>
    %25 = vector.broadcast %24 : vector<2x1xf32> to vector<2x256xf32>
    %26 = arith.addf %23, %25 : vector<2x256xf32>
    %cst_19 = arith.constant 0.000000e+00 : f32
    %27 = vector.broadcast %cst_19 : f32 to vector<2x256xf32>
    %28 = arith.maximumf %26, %27 : vector<2x256xf32>
    %cst_20 = arith.constant 0.000000e+00 : f32
    %29 = vector.broadcast %cst_20 : f32 to vector<2x392xf32>
    %c0_21 = arith.constant 0 : index
    %c0_22 = arith.constant 0 : index
    %30 = vector.load %arg13[%c0_21, %c0_22] : memref<2x392xf32, #tpu.memory_space<vmem>>, vector<2x392xf32>
    tpu.vector_store %arg13[%c0_21, %c0_22], %29 {strides = array<i32>} : memref<2x392xf32, #tpu.memory_space<vmem>>, vector<2x392xf32>,
    %31 = tpu.iota {dimensions = array<i32: 1>} : vector<1x256xi32>
    %c16_i32 = arith.constant 16 : i32
    %c0_i32 = arith.constant 0 : i32
    %32 = arith.cmpi eq, %c16_i32, %c0_i32 : i32
    %c1_i32 = arith.constant 1 : i32
    %33 = arith.select %32, %c1_i32, %c16_i32 : i32
    %34 = vector.broadcast %33 : i32 to vector<1x256xi32>
    %35 = arith.remsi %31, %34 : vector<1x256xi32>
    %c0_i32_23 = arith.constant 0 : i32
    %36 = vector.broadcast %c0_i32_23 : i32 to vector<1x256xi32>
    %37 = arith.cmpi ne, %35, %36 : vector<1x256xi32>
    %c0_i32_24 = arith.constant 0 : i32
    %38 = vector.broadcast %c0_i32_24 : i32 to vector<1x256xi32>
    %39 = arith.cmpi slt, %35, %38 : vector<1x256xi32>
    %c0_i32_25 = arith.constant 0 : i32
    %40 = arith.cmpi slt, %33, %c0_i32_25 : i32
    %41 = vector.broadcast %40 : i1 to vector<1x256xi1>
    %42 = vector.broadcast %41 : vector<1x256xi1> to vector<1x256xi1>
    %43 = arith.xori %39, %42 : vector<1x256xi1>
    %44 = arith.andi %43, %37 : vector<1x256xi1>
    %45 = vector.broadcast %33 : i32 to vector<1x256xi32>
    %46 = arith.addi %35, %45 : vector<1x256xi32>
    %47 = arith.select %44, %46, %35 : vector<1x256xi1>, vector<1x256xi32>
    %c0_26 = arith.constant 0 : index
    %c68 = arith.constant 68 : index
    %48 = vector.load %arg13[%c0_26, %c68] : memref<2x392xf32, #tpu.memory_space<vmem>>, vector<2x256xf32>
    tpu.vector_store %arg13[%c0_26, %c68], %28 {strides = array<i32>} : memref<2x392xf32, #tpu.memory_space<vmem>>, vector<2x256xf32>,
    %c0_27 = arith.constant 0 : index
    %c0_28 = arith.constant 0 : index
    %49 = vector.load %arg13[%c0_27, %c0_28] : memref<2x392xf32, #tpu.memory_space<vmem>>, vector<2x256xf32>
    %c-4_i32 = arith.constant -4 : i32
    %50 = vector.broadcast %c-4_i32 : i32 to vector<1x256xi32>
    %51 = arith.addi %47, %50 : vector<1x256xi32>
    %c0_i32_29 = arith.constant 0 : i32
    %52 = vector.broadcast %c0_i32_29 : i32 to vector<1x256xi32>
    %53 = arith.cmpi sge, %51, %52 : vector<1x256xi32>
    %c-4_i32_30 = arith.constant -4 : i32
    %54 = vector.broadcast %c-4_i32_30 : i32 to vector<1x256xi32>
    %55 = arith.addi %47, %54 : vector<1x256xi32>
    %c16_i32_31 = arith.constant 16 : i32
    %56 = vector.broadcast %c16_i32_31 : i32 to vector<1x256xi32>
    %57 = arith.cmpi slt, %55, %56 : vector<1x256xi32>
    %58 = arith.andi %53, %57 : vector<1x256xi1>
    %cst_32 = arith.constant 0.000000e+00 : f32
    %59 = vector.shape_cast %58 : vector<1x256xi1> to vector<1x256xi1>
    %60 = vector.broadcast %59 : vector<1x256xi1> to vector<2x256xi1>
    %61 = vector.broadcast %cst_32 : f32 to vector<2x256xf32>
    %62 = arith.select %60, %49, %61 : vector<2x256xi1>, vector<2x256xf32>
    %c0_33 = arith.constant 0 : index
    %c4 = arith.constant 4 : index
    %63 = vector.load %arg13[%c0_33, %c4] : memref<2x392xf32, #tpu.memory_space<vmem>>, vector<2x256xf32>
    %c0_34 = arith.constant 0 : index
    %c8 = arith.constant 8 : index
    %64 = vector.load %arg13[%c0_34, %c8] : memref<2x392xf32, #tpu.memory_space<vmem>>, vector<2x256xf32>
    %c4_i32 = arith.constant 4 : i32
    %65 = vector.broadcast %c4_i32 : i32 to vector<1x256xi32>
    %66 = arith.addi %47, %65 : vector<1x256xi32>
    %c0_i32_35 = arith.constant 0 : i32
    %67 = vector.broadcast %c0_i32_35 : i32 to vector<1x256xi32>
    %68 = arith.cmpi sge, %66, %67 : vector<1x256xi32>
    %c4_i32_36 = arith.constant 4 : i32
    %69 = vector.broadcast %c4_i32_36 : i32 to vector<1x256xi32>
    %70 = arith.addi %47, %69 : vector<1x256xi32>
    %c16_i32_37 = arith.constant 16 : i32
    %71 = vector.broadcast %c16_i32_37 : i32 to vector<1x256xi32>
    %72 = arith.cmpi slt, %70, %71 : vector<1x256xi32>
    %73 = arith.andi %68, %72 : vector<1x256xi1>
    %cst_38 = arith.constant 0.000000e+00 : f32
    %74 = vector.shape_cast %73 : vector<1x256xi1> to vector<1x256xi1>
    %75 = vector.broadcast %74 : vector<1x256xi1> to vector<2x256xi1>
    %76 = vector.broadcast %cst_38 : f32 to vector<2x256xf32>
    %77 = arith.select %75, %64, %76 : vector<2x256xi1>, vector<2x256xf32>
    %c0_39 = arith.constant 0 : index
    %c64 = arith.constant 64 : index
    %78 = vector.load %arg13[%c0_39, %c64] : memref<2x392xf32, #tpu.memory_space<vmem>>, vector<2x256xf32>
    %c-4_i32_40 = arith.constant -4 : i32
    %79 = vector.broadcast %c-4_i32_40 : i32 to vector<1x256xi32>
    %80 = arith.addi %47, %79 : vector<1x256xi32>
    %c0_i32_41 = arith.constant 0 : i32
    %81 = vector.broadcast %c0_i32_41 : i32 to vector<1x256xi32>
    %82 = arith.cmpi sge, %80, %81 : vector<1x256xi32>
    %c-4_i32_42 = arith.constant -4 : i32
    %83 = vector.broadcast %c-4_i32_42 : i32 to vector<1x256xi32>
    %84 = arith.addi %47, %83 : vector<1x256xi32>
    %c16_i32_43 = arith.constant 16 : i32
    %85 = vector.broadcast %c16_i32_43 : i32 to vector<1x256xi32>
    %86 = arith.cmpi slt, %84, %85 : vector<1x256xi32>
    %87 = arith.andi %82, %86 : vector<1x256xi1>
    %cst_44 = arith.constant 0.000000e+00 : f32
    %88 = vector.shape_cast %87 : vector<1x256xi1> to vector<1x256xi1>
    %89 = vector.broadcast %88 : vector<1x256xi1> to vector<2x256xi1>
    %90 = vector.broadcast %cst_44 : f32 to vector<2x256xf32>
    %91 = arith.select %89, %78, %90 : vector<2x256xi1>, vector<2x256xf32>
    %c0_45 = arith.constant 0 : index
    %c68_46 = arith.constant 68 : index
    %92 = vector.load %arg13[%c0_45, %c68_46] : memref<2x392xf32, #tpu.memory_space<vmem>>, vector<2x256xf32>
    %c0_47 = arith.constant 0 : index
    %c72 = arith.constant 72 : index
    %93 = vector.load %arg13[%c0_47, %c72] : memref<2x392xf32, #tpu.memory_space<vmem>>, vector<2x256xf32>
    %c4_i32_48 = arith.constant 4 : i32
    %94 = vector.broadcast %c4_i32_48 : i32 to vector<1x256xi32>
    %95 = arith.addi %47, %94 : vector<1x256xi32>
    %c0_i32_49 = arith.constant 0 : i32
    %96 = vector.broadcast %c0_i32_49 : i32 to vector<1x256xi32>
    %97 = arith.cmpi sge, %95, %96 : vector<1x256xi32>
    %c4_i32_50 = arith.constant 4 : i32
    %98 = vector.broadcast %c4_i32_50 : i32 to vector<1x256xi32>
    %99 = arith.addi %47, %98 : vector<1x256xi32>
    %c16_i32_51 = arith.constant 16 : i32
    %100 = vector.broadcast %c16_i32_51 : i32 to vector<1x256xi32>
    %101 = arith.cmpi slt, %99, %100 : vector<1x256xi32>
    %102 = arith.andi %97, %101 : vector<1x256xi1>
    %cst_52 = arith.constant 0.000000e+00 : f32
    %103 = vector.shape_cast %102 : vector<1x256xi1> to vector<1x256xi1>
    %104 = vector.broadcast %103 : vector<1x256xi1> to vector<2x256xi1>
    %105 = vector.broadcast %cst_52 : f32 to vector<2x256xf32>
    %106 = arith.select %104, %93, %105 : vector<2x256xi1>, vector<2x256xf32>
    %c0_53 = arith.constant 0 : index
    %c128 = arith.constant 128 : index
    %107 = vector.load %arg13[%c0_53, %c128] : memref<2x392xf32, #tpu.memory_space<vmem>>, vector<2x256xf32>
    %c-4_i32_54 = arith.constant -4 : i32
    %108 = vector.broadcast %c-4_i32_54 : i32 to vector<1x256xi32>
    %109 = arith.addi %47, %108 : vector<1x256xi32>
    %c0_i32_55 = arith.constant 0 : i32
    %110 = vector.broadcast %c0_i32_55 : i32 to vector<1x256xi32>
    %111 = arith.cmpi sge, %109, %110 : vector<1x256xi32>
    %c-4_i32_56 = arith.constant -4 : i32
    %112 = vector.broadcast %c-4_i32_56 : i32 to vector<1x256xi32>
    %113 = arith.addi %47, %112 : vector<1x256xi32>
    %c16_i32_57 = arith.constant 16 : i32
    %114 = vector.broadcast %c16_i32_57 : i32 to vector<1x256xi32>
    %115 = arith.cmpi slt, %113, %114 : vector<1x256xi32>
    %116 = arith.andi %111, %115 : vector<1x256xi1>
    %cst_58 = arith.constant 0.000000e+00 : f32
    %117 = vector.shape_cast %116 : vector<1x256xi1> to vector<1x256xi1>
    %118 = vector.broadcast %117 : vector<1x256xi1> to vector<2x256xi1>
    %119 = vector.broadcast %cst_58 : f32 to vector<2x256xf32>
    %120 = arith.select %118, %107, %119 : vector<2x256xi1>, vector<2x256xf32>
    %c0_59 = arith.constant 0 : index
    %c132 = arith.constant 132 : index
    %121 = vector.load %arg13[%c0_59, %c132] : memref<2x392xf32, #tpu.memory_space<vmem>>, vector<2x256xf32>
    %c0_60 = arith.constant 0 : index
    %c136 = arith.constant 136 : index
    %122 = vector.load %arg13[%c0_60, %c136] : memref<2x392xf32, #tpu.memory_space<vmem>>, vector<2x256xf32>
    %c4_i32_61 = arith.constant 4 : i32
    %123 = vector.broadcast %c4_i32_61 : i32 to vector<1x256xi32>
    %124 = arith.addi %47, %123 : vector<1x256xi32>
    %c0_i32_62 = arith.constant 0 : i32
    %125 = vector.broadcast %c0_i32_62 : i32 to vector<1x256xi32>
    %126 = arith.cmpi sge, %124, %125 : vector<1x256xi32>
    %c4_i32_63 = arith.constant 4 : i32
    %127 = vector.broadcast %c4_i32_63 : i32 to vector<1x256xi32>
    %128 = arith.addi %47, %127 : vector<1x256xi32>
    %c16_i32_64 = arith.constant 16 : i32
    %129 = vector.broadcast %c16_i32_64 : i32 to vector<1x256xi32>
    %130 = arith.cmpi slt, %128, %129 : vector<1x256xi32>
    %131 = arith.andi %126, %130 : vector<1x256xi1>
    %cst_65 = arith.constant 0.000000e+00 : f32
    %132 = vector.shape_cast %131 : vector<1x256xi1> to vector<1x256xi1>
    %133 = vector.broadcast %132 : vector<1x256xi1> to vector<2x256xi1>
    %134 = vector.broadcast %cst_65 : f32 to vector<2x256xf32>
    %135 = arith.select %133, %122, %134 : vector<2x256xi1>, vector<2x256xf32>
    %136 = tpu.concatenate %62, %63, %77, %91, %92, %106, %120, %121, %135 in 0 : vector<2x256xf32>, vector<2x256xf32>, vector<2x256xf32>, vector<2x256xf32>, vector<2x256xf32>, vector<2x256xf32>, vector<2x256xf32>, vector<2x256xf32>, vector<2x256xf32> -> vector<18x256xf32>
    %c0_66 = arith.constant 0 : index
    %c0_67 = arith.constant 0 : index
    %c0_68 = arith.constant 0 : index
    %137 = vector.load %arg8[%c0_66, %c0_67, %c0_68] : memref<2x2x18xf32, #tpu.memory_space<vmem>>, vector<1x2x18xf32>
    %138 = vector.shape_cast %137 : vector<1x2x18xf32> to vector<2x18xf32>
    %cst_69 = arith.constant dense<0.000000e+00> : vector<2x256xf32>
    %139 = tpu.matmul %138, %136, %cst_69 {dimension_numbers = #tpu.dot_dimension_numbers<[1], [0], [0], [1], [0, 0, 1, 1], [], []>, precision = #tpu.contract_precision<fp32>} : vector<2x18xf32>, vector<18x256xf32>, vector<2x256xf32> -> vector<2x256xf32>
    %c0_70 = arith.constant 0 : index
    %c0_71 = arith.constant 0 : index
    %c0_72 = arith.constant 0 : index
    %140 = vector.load %arg9[%c0_70, %c0_71, %c0_72] : memref<2x2x1xf32, #tpu.memory_space<vmem>>, vector<1x2x1xf32>
    %141 = vector.shape_cast %140 : vector<1x2x1xf32> to vector<2x1xf32>
    %142 = vector.broadcast %141 : vector<2x1xf32> to vector<2x256xf32>
    %143 = arith.addf %139, %142 : vector<2x256xf32>
    %cst_73 = arith.constant 0.000000e+00 : f32
    %144 = vector.broadcast %cst_73 : f32 to vector<2x256xf32>
    %145 = arith.maximumf %143, %144 : vector<2x256xf32>
    %c0_74 = arith.constant 0 : index
    %c68_75 = arith.constant 68 : index
    %146 = vector.load %arg13[%c0_74, %c68_75] : memref<2x392xf32, #tpu.memory_space<vmem>>, vector<2x256xf32>
    tpu.vector_store %arg13[%c0_74, %c68_75], %145 {strides = array<i32>} : memref<2x392xf32, #tpu.memory_space<vmem>>, vector<2x256xf32>,
    %c0_76 = arith.constant 0 : index
    %c0_77 = arith.constant 0 : index
    %147 = vector.load %arg13[%c0_76, %c0_77] : memref<2x392xf32, #tpu.memory_space<vmem>>, vector<2x256xf32>
    %c-4_i32_78 = arith.constant -4 : i32
    %148 = vector.broadcast %c-4_i32_78 : i32 to vector<1x256xi32>
    %149 = arith.addi %47, %148 : vector<1x256xi32>
    %c0_i32_79 = arith.constant 0 : i32
    %150 = vector.broadcast %c0_i32_79 : i32 to vector<1x256xi32>
    %151 = arith.cmpi sge, %149, %150 : vector<1x256xi32>
    %c-4_i32_80 = arith.constant -4 : i32
    %152 = vector.broadcast %c-4_i32_80 : i32 to vector<1x256xi32>
    %153 = arith.addi %47, %152 : vector<1x256xi32>
    %c16_i32_81 = arith.constant 16 : i32
    %154 = vector.broadcast %c16_i32_81 : i32 to vector<1x256xi32>
    %155 = arith.cmpi slt, %153, %154 : vector<1x256xi32>
    %156 = arith.andi %151, %155 : vector<1x256xi1>
    %cst_82 = arith.constant 0.000000e+00 : f32
    %157 = vector.shape_cast %156 : vector<1x256xi1> to vector<1x256xi1>
    %158 = vector.broadcast %157 : vector<1x256xi1> to vector<2x256xi1>
    %159 = vector.broadcast %cst_82 : f32 to vector<2x256xf32>
    %160 = arith.select %158, %147, %159 : vector<2x256xi1>, vector<2x256xf32>
    %c0_83 = arith.constant 0 : index
    %c4_84 = arith.constant 4 : index
    %161 = vector.load %arg13[%c0_83, %c4_84] : memref<2x392xf32, #tpu.memory_space<vmem>>, vector<2x256xf32>
    %c0_85 = arith.constant 0 : index
    %c8_86 = arith.constant 8 : index
    %162 = vector.load %arg13[%c0_85, %c8_86] : memref<2x392xf32, #tpu.memory_space<vmem>>, vector<2x256xf32>
    %c4_i32_87 = arith.constant 4 : i32
    %163 = vector.broadcast %c4_i32_87 : i32 to vector<1x256xi32>
    %164 = arith.addi %47, %163 : vector<1x256xi32>
    %c0_i32_88 = arith.constant 0 : i32
    %165 = vector.broadcast %c0_i32_88 : i32 to vector<1x256xi32>
    %166 = arith.cmpi sge, %164, %165 : vector<1x256xi32>
    %c4_i32_89 = arith.constant 4 : i32
    %167 = vector.broadcast %c4_i32_89 : i32 to vector<1x256xi32>
    %168 = arith.addi %47, %167 : vector<1x256xi32>
    %c16_i32_90 = arith.constant 16 : i32
    %169 = vector.broadcast %c16_i32_90 : i32 to vector<1x256xi32>
    %170 = arith.cmpi slt, %168, %169 : vector<1x256xi32>
    %171 = arith.andi %166, %170 : vector<1x256xi1>
    %cst_91 = arith.constant 0.000000e+00 : f32
    %172 = vector.shape_cast %171 : vector<1x256xi1> to vector<1x256xi1>
    %173 = vector.broadcast %172 : vector<1x256xi1> to vector<2x256xi1>
    %174 = vector.broadcast %cst_91 : f32 to vector<2x256xf32>
    %175 = arith.select %173, %162, %174 : vector<2x256xi1>, vector<2x256xf32>
    %c0_92 = arith.constant 0 : index
    %c64_93 = arith.constant 64 : index
    %176 = vector.load %arg13[%c0_92, %c64_93] : memref<2x392xf32, #tpu.memory_space<vmem>>, vector<2x256xf32>
    %c-4_i32_94 = arith.constant -4 : i32
    %177 = vector.broadcast %c-4_i32_94 : i32 to vector<1x256xi32>
    %178 = arith.addi %47, %177 : vector<1x256xi32>
    %c0_i32_95 = arith.constant 0 : i32
    %179 = vector.broadcast %c0_i32_95 : i32 to vector<1x256xi32>
    %180 = arith.cmpi sge, %178, %179 : vector<1x256xi32>
    %c-4_i32_96 = arith.constant -4 : i32
    %181 = vector.broadcast %c-4_i32_96 : i32 to vector<1x256xi32>
    %182 = arith.addi %47, %181 : vector<1x256xi32>
    %c16_i32_97 = arith.constant 16 : i32
    %183 = vector.broadcast %c16_i32_97 : i32 to vector<1x256xi32>
    %184 = arith.cmpi slt, %182, %183 : vector<1x256xi32>
    %185 = arith.andi %180, %184 : vector<1x256xi1>
    %cst_98 = arith.constant 0.000000e+00 : f32
    %186 = vector.shape_cast %185 : vector<1x256xi1> to vector<1x256xi1>
    %187 = vector.broadcast %186 : vector<1x256xi1> to vector<2x256xi1>
    %188 = vector.broadcast %cst_98 : f32 to vector<2x256xf32>
    %189 = arith.select %187, %176, %188 : vector<2x256xi1>, vector<2x256xf32>
    %c0_99 = arith.constant 0 : index
    %c68_100 = arith.constant 68 : index
    %190 = vector.load %arg13[%c0_99, %c68_100] : memref<2x392xf32, #tpu.memory_space<vmem>>, vector<2x256xf32>
    %c0_101 = arith.constant 0 : index
    %c72_102 = arith.constant 72 : index
    %191 = vector.load %arg13[%c0_101, %c72_102] : memref<2x392xf32, #tpu.memory_space<vmem>>, vector<2x256xf32>
    %c4_i32_103 = arith.constant 4 : i32
    %192 = vector.broadcast %c4_i32_103 : i32 to vector<1x256xi32>
    %193 = arith.addi %47, %192 : vector<1x256xi32>
    %c0_i32_104 = arith.constant 0 : i32
    %194 = vector.broadcast %c0_i32_104 : i32 to vector<1x256xi32>
    %195 = arith.cmpi sge, %193, %194 : vector<1x256xi32>
    %c4_i32_105 = arith.constant 4 : i32
    %196 = vector.broadcast %c4_i32_105 : i32 to vector<1x256xi32>
    %197 = arith.addi %47, %196 : vector<1x256xi32>
    %c16_i32_106 = arith.constant 16 : i32
    %198 = vector.broadcast %c16_i32_106 : i32 to vector<1x256xi32>
    %199 = arith.cmpi slt, %197, %198 : vector<1x256xi32>
    %200 = arith.andi %195, %199 : vector<1x256xi1>
    %cst_107 = arith.constant 0.000000e+00 : f32
    %201 = vector.shape_cast %200 : vector<1x256xi1> to vector<1x256xi1>
    %202 = vector.broadcast %201 : vector<1x256xi1> to vector<2x256xi1>
    %203 = vector.broadcast %cst_107 : f32 to vector<2x256xf32>
    %204 = arith.select %202, %191, %203 : vector<2x256xi1>, vector<2x256xf32>
    %c0_108 = arith.constant 0 : index
    %c128_109 = arith.constant 128 : index
    %205 = vector.load %arg13[%c0_108, %c128_109] : memref<2x392xf32, #tpu.memory_space<vmem>>, vector<2x256xf32>
    %c-4_i32_110 = arith.constant -4 : i32
    %206 = vector.broadcast %c-4_i32_110 : i32 to vector<1x256xi32>
    %207 = arith.addi %47, %206 : vector<1x256xi32>
    %c0_i32_111 = arith.constant 0 : i32
    %208 = vector.broadcast %c0_i32_111 : i32 to vector<1x256xi32>
    %209 = arith.cmpi sge, %207, %208 : vector<1x256xi32>
    %c-4_i32_112 = arith.constant -4 : i32
    %210 = vector.broadcast %c-4_i32_112 : i32 to vector<1x256xi32>
    %211 = arith.addi %47, %210 : vector<1x256xi32>
    %c16_i32_113 = arith.constant 16 : i32
    %212 = vector.broadcast %c16_i32_113 : i32 to vector<1x256xi32>
    %213 = arith.cmpi slt, %211, %212 : vector<1x256xi32>
    %214 = arith.andi %209, %213 : vector<1x256xi1>
    %cst_114 = arith.constant 0.000000e+00 : f32
    %215 = vector.shape_cast %214 : vector<1x256xi1> to vector<1x256xi1>
    %216 = vector.broadcast %215 : vector<1x256xi1> to vector<2x256xi1>
    %217 = vector.broadcast %cst_114 : f32 to vector<2x256xf32>
    %218 = arith.select %216, %205, %217 : vector<2x256xi1>, vector<2x256xf32>
    %c0_115 = arith.constant 0 : index
    %c132_116 = arith.constant 132 : index
    %219 = vector.load %arg13[%c0_115, %c132_116] : memref<2x392xf32, #tpu.memory_space<vmem>>, vector<2x256xf32>
    %c0_117 = arith.constant 0 : index
    %c136_118 = arith.constant 136 : index
    %220 = vector.load %arg13[%c0_117, %c136_118] : memref<2x392xf32, #tpu.memory_space<vmem>>, vector<2x256xf32>
    %c4_i32_119 = arith.constant 4 : i32
    %221 = vector.broadcast %c4_i32_119 : i32 to vector<1x256xi32>
    %222 = arith.addi %47, %221 : vector<1x256xi32>
    %c0_i32_120 = arith.constant 0 : i32
    %223 = vector.broadcast %c0_i32_120 : i32 to vector<1x256xi32>
    %224 = arith.cmpi sge, %222, %223 : vector<1x256xi32>
    %c4_i32_121 = arith.constant 4 : i32
    %225 = vector.broadcast %c4_i32_121 : i32 to vector<1x256xi32>
    %226 = arith.addi %47, %225 : vector<1x256xi32>
    %c16_i32_122 = arith.constant 16 : i32
    %227 = vector.broadcast %c16_i32_122 : i32 to vector<1x256xi32>
    %228 = arith.cmpi slt, %226, %227 : vector<1x256xi32>
    %229 = arith.andi %224, %228 : vector<1x256xi1>
    %cst_123 = arith.constant 0.000000e+00 : f32
    %230 = vector.shape_cast %229 : vector<1x256xi1> to vector<1x256xi1>
    %231 = vector.broadcast %230 : vector<1x256xi1> to vector<2x256xi1>
    %232 = vector.broadcast %cst_123 : f32 to vector<2x256xf32>
    %233 = arith.select %231, %220, %232 : vector<2x256xi1>, vector<2x256xf32>
    %234 = tpu.concatenate %160, %161, %175, %189, %190, %204, %218, %219, %233 in 0 : vector<2x256xf32>, vector<2x256xf32>, vector<2x256xf32>, vector<2x256xf32>, vector<2x256xf32>, vector<2x256xf32>, vector<2x256xf32>, vector<2x256xf32>, vector<2x256xf32> -> vector<18x256xf32>
    %c1 = arith.constant 1 : index
    %c0_124 = arith.constant 0 : index
    %c0_125 = arith.constant 0 : index
    %235 = vector.load %arg8[%c1, %c0_124, %c0_125] : memref<2x2x18xf32, #tpu.memory_space<vmem>>, vector<1x2x18xf32>
    %236 = vector.shape_cast %235 : vector<1x2x18xf32> to vector<2x18xf32>
    %cst_126 = arith.constant dense<0.000000e+00> : vector<2x256xf32>
    %237 = tpu.matmul %236, %234, %cst_126 {dimension_numbers = #tpu.dot_dimension_numbers<[1], [0], [0], [1], [0, 0, 1, 1], [], []>, precision = #tpu.contract_precision<fp32>} : vector<2x18xf32>, vector<18x256xf32>, vector<2x256xf32> -> vector<2x256xf32>
    %c1_127 = arith.constant 1 : index
    %c0_128 = arith.constant 0 : index
    %c0_129 = arith.constant 0 : index
    %238 = vector.load %arg9[%c1_127, %c0_128, %c0_129] : memref<2x2x1xf32, #tpu.memory_space<vmem>>, vector<1x2x1xf32>
    %239 = vector.shape_cast %238 : vector<1x2x1xf32> to vector<2x1xf32>
    %240 = vector.broadcast %239 : vector<2x1xf32> to vector<2x256xf32>
    %241 = arith.addf %237, %240 : vector<2x256xf32>
    %cst_130 = arith.constant 0.000000e+00 : f32
    %242 = vector.broadcast %cst_130 : f32 to vector<2x256xf32>
    %243 = arith.maximumf %241, %242 : vector<2x256xf32>
    %c0_131 = arith.constant 0 : index
    %c0_132 = arith.constant 0 : index
    %244 = vector.load %arg10[%c0_131, %c0_132] : memref<2x1xf32, #tpu.memory_space<vmem>>, vector<2x1xf32>
    %245 = vector.broadcast %244 : vector<2x1xf32> to vector<2x256xf32>
    %246 = arith.mulf %245, %243 : vector<2x256xf32>
    %cst_133 = arith.constant dense<0.000000e+00> : vector<256xf32>
    %247 = vector.multi_reduction <add>, %246, %cst_133 [0] : vector<2x256xf32> to vector<256xf32>
    %248 = vector.shape_cast %247 : vector<256xf32> to vector<1x256xf32>
    %c0_134 = arith.constant 0 : index
    %c0_135 = arith.constant 0 : index
    %249 = vector.load %arg11[%c0_134, %c0_135] : memref<1x1xf32, #tpu.memory_space<vmem>>, vector<1x1xf32>
    %250 = vector.broadcast %249 : vector<1x1xf32> to vector<1x256xf32>
    %251 = arith.addf %248, %250 : vector<1x256xf32>
    %252 = vector.broadcast %21 : vector<32x1xf32> to vector<32x256xf32>
    %253 = vector.broadcast %251 : vector<1x256xf32> to vector<32x256xf32>
    %254 = arith.mulf %252, %253 : vector<32x256xf32>
    %255 = arith.negf %254 : vector<32x256xf32>
    %256 = math.exp %255 : vector<32x256xf32>
    %cst_136 = arith.constant 1.000000e+00 : f32
    %257 = vector.broadcast %cst_136 : f32 to vector<32x256xf32>
    %258 = arith.addf %257, %256 : vector<32x256xf32>
    %259 = arith.divf %257, %258 : vector<32x256xf32>
    %c0_137 = arith.constant 0 : index
    %c0_138 = arith.constant 0 : index
    %c0_139 = arith.constant 0 : index
    %260 = vector.load %arg12[%c0_137, %c0_138, %c0_139] : memref<1x32x256xf32, #tpu.memory_space<vmem>>, vector<1x32x256xf32>
    %261 = vector.shape_cast %260 : vector<1x32x256xf32> to vector<32x256xf32>
    %262 = vector.shape_cast %259 : vector<32x256xf32> to vector<1x32x256xf32>
    tpu.vector_store %arg12[%c0_137, %c0_138, %c0_139], %262 {strides = array<i32>} : memref<1x32x256xf32, #tpu.memory_space<vmem>>, vector<1x32x256xf32>,
    return
  }
  func.func @transform_0(%arg0: i32) -> (i32, i32, i32) {
    %c0_i32 = arith.constant 0 : i32
    %c0_i32_0 = arith.constant 0 : i32
    %c0_i32_1 = arith.constant 0 : i32
    return %arg0, %c0_i32, %c0_i32_0 : i32, i32, i32
  }
  func.func @transform_1(%arg0: i32) -> (i32, i32) {
    %c0_i32 = arith.constant 0 : i32
    %c0_i32_0 = arith.constant 0 : i32
    %c0_i32_1 = arith.constant 0 : i32
    return %c0_i32, %c0_i32_0 : i32, i32
  }
  func.func @transform_2(%arg0: i32) -> (i32, i32) {
    %c0_i32 = arith.constant 0 : i32
    %c0_i32_0 = arith.constant 0 : i32
    %c0_i32_1 = arith.constant 0 : i32
    return %c0_i32, %c0_i32_0 : i32, i32
  }
  func.func @transform_3(%arg0: i32) -> (i32, i32) {
    %c0_i32 = arith.constant 0 : i32
    %c0_i32_0 = arith.constant 0 : i32
    %c0_i32_1 = arith.constant 0 : i32
    return %c0_i32, %c0_i32_0 : i32, i32
  }
  func.func @transform_4(%arg0: i32) -> (i32, i32) {
    %c0_i32 = arith.constant 0 : i32
    %c0_i32_0 = arith.constant 0 : i32
    %c0_i32_1 = arith.constant 0 : i32
    return %c0_i32, %c0_i32_0 : i32, i32
  }
  func.func @transform_5(%arg0: i32) -> (i32, i32) {
    %c0_i32 = arith.constant 0 : i32
    %c0_i32_0 = arith.constant 0 : i32
    %c0_i32_1 = arith.constant 0 : i32
    return %c0_i32, %c0_i32_0 : i32, i32
  }
  func.func @transform_6(%arg0: i32) -> (i32, i32) {
    %c0_i32 = arith.constant 0 : i32
    %c0_i32_0 = arith.constant 0 : i32
    %c0_i32_1 = arith.constant 0 : i32
    return %c0_i32, %c0_i32_0 : i32, i32
  }
  func.func @transform_7(%arg0: i32) -> (i32, i32, i32) {
    %c0_i32 = arith.constant 0 : i32
    %c0_i32_0 = arith.constant 0 : i32
    %c0_i32_1 = arith.constant 0 : i32
    %c0_i32_2 = arith.constant 0 : i32
    return %c0_i32, %c0_i32_0, %c0_i32_1 : i32, i32, i32
  }
  func.func @transform_8(%arg0: i32) -> (i32, i32, i32) {
    %c0_i32 = arith.constant 0 : i32
    %c0_i32_0 = arith.constant 0 : i32
    %c0_i32_1 = arith.constant 0 : i32
    %c0_i32_2 = arith.constant 0 : i32
    return %c0_i32, %c0_i32_0, %c0_i32_1 : i32, i32, i32
  }
  func.func @transform_9(%arg0: i32) -> (i32, i32) {
    %c0_i32 = arith.constant 0 : i32
    %c0_i32_0 = arith.constant 0 : i32
    %c0_i32_1 = arith.constant 0 : i32
    return %c0_i32, %c0_i32_0 : i32, i32
  }
  func.func @transform_10(%arg0: i32) -> (i32, i32) {
    %c0_i32 = arith.constant 0 : i32
    %c0_i32_0 = arith.constant 0 : i32
    %c0_i32_1 = arith.constant 0 : i32
    return %c0_i32, %c0_i32_0 : i32, i32
  }
  func.func @transform_11(%arg0: i32) -> (i32, i32, i32) {
    %c0_i32 = arith.constant 0 : i32
    %c0_i32_0 = arith.constant 0 : i32
    %c0_i32_1 = arith.constant 0 : i32
    return %arg0, %c0_i32, %c0_i32_0 : i32, i32, i32
  }
}

</mosaic_0001>

<bundles_post_ra>
// kernel: bam_forward.1
= control target key start
LH: loop header
LB: loop body
LE: loop exit
PB: predicated region body
PF: predicated region fallthrough
CT: control target
= control target key end

     0   :  { %s3067_s19 = smov 0   ;;  %s3554_s0 = inlined_call_operand.vmem [shape: f32[2,32,256], index: 0, kind: input, shape index: {}]   ;;  %s3555_s1 = inlined_call_operand.vmem [shape: f32[32,2], index: 1, kind: input, shape index: {}]   ;;  %s3556_s2 = inlined_call_operand.vmem [shape: f32[1,2], index: 2, kind: input, shape index: {}]   ;;  %s3557_s3 = inlined_call_operand.vmem [shape: f32[32,2], index: 3, kind: input, shape index: {}]   ;;  %s3558_s4 = inlined_call_operand.vmem [shape: f32[32,1], index: 4, kind: input, shape index: {}]   ;;  %s3559_s5 = inlined_call_operand.vmem [shape: f32[2,32], index: 5, kind: input, shape index: {}]   ;;  %s3560_s6 = inlined_call_operand.vmem [shape: f32[2,1], index: 6, kind: input, shape index: {}]   ;;  %s3561_s7 = inlined_call_operand.vmem [shape: f32[2,2,18], index: 7, kind: input, shape index: {}]   ;;  %s3562_s8 = inlined_call_operand.vmem [shape: f32[2,2,1], index: 8, kind: input, shape index: {}]   ;;  %s3563_s9 = inlined_call_operand.vmem [shape: f32[2,1], index: 9, kind: input, shape index: {}]   ;;  %s3564_s10 = inlined_call_operand.<no memory space> [shape: f32[1,1], index: 10, kind: input, shape index: {}]   ;;  %s3565_s11 = inlined_call_operand.vmem [shape: f32[2,32,256], index: 11, kind: output, shape index: {}]  }
   0x1   :  { %v16_v0 = vstv %s3564_s10 }
   0x2   :  { %17 = vst [vmem:[#allocation3] sm:$0x1] %v16_v0 }
   0x3 LB: > { %s2769_s20 = sadd.s32 4294967295, %s2993_s19   ;;  %p2773_p0 = scmp.ge.s32.totalorder %s2993_s19, 1  ;;  %s2993_s19 = sphi %s3067_s19, %s23_s19  }
   0x4   : > { %p339_p1 = scmp.lt.s32.totalorder %s2993_s19, 3 }
   0x6   : > { %p340_p2 = pnand %p2773_p0, %p339_p1 }
   0x7   : > { %p379_p3 = scmp.lt.s32.totalorder (!%p340_p2), %s2769_s20, 1  ;;  %v470_v1 = vld [vmem:[%s3559_s5] sm:$0x3] (!%p340_p2)  ;;  %vm477_vm0 = vcmask (!%p340_p2), 261120   ;;  %v2995_v2 = vmov (!%p340_p2), 0.0   ;;  %v2996_v4 = vmov (!%p340_p2), 0  }
   0x8   : > { %343 = sbr.rel (%p340_p2) target bundleno = 1516 (0x5ec), region = 64  ;;  %553 = vmatprep.mubr.f32.mxu0 (!%p340_p2), %v2995_v2  ;;  %v479_v3 = vsel (!%p340_p2), %vm477_vm0, %v470_v1, 0  ;;  %2945 = vset.pattern.permute.xlu0 (!%p340_p2), %v2996_v4  ;;  %v471_v5 = vld [vmem:[%s3560_s6] sm:$0x3] (!%p340_p2)  ;;  %vm1026_vm1 = vcmask (!%p340_p2), 1041408   ;;  %vm1027_vm2 = vcmask (!%p340_p2), 1043458  }
   0x9   : > { %v3084_v6 = vand.u32 (!%p340_p2), 4294901760, %v479_v3  ;;  %474 = vperm.xlu0 (!%p340_p2), %2945, %v471_v5   ;;  %1587 = vmatprep.mubr.f32.mxu1 (!%p340_p2), %v2995_v2  ;;  %vm1029_vm3 = vcmask (!%p340_p2), 1045508   ;;  %vm1031_vm4 = vcmask (!%p340_p2), 64518   ;;  %vm1028_vm5 = vmor (!%p340_p2), %vm1027_vm2, %vm1026_vm1  ;;  %s2998_s28 = smov (!%p340_p2), 68   ;;  %vm1077_vm8 = vcmask (!%p340_p2), 1041952   ;;  %s2999_s29 = smov (!%p340_p2), 120  }
   0xa   : > { %2946 = vset.pattern.permute.xlu1 (!%p340_p2), %v2996_v4  ;;  %vm1030_vm6 = vmor (!%p340_p2), %vm1029_vm3, %vm1028_vm5  ;;  %vm1079_vm10 = vcmask (!%p340_p2), 553988   ;;  %vm1074_vm11 = vcmask (!%p340_p2), 556032   ;;  %s3000_s30 = smov (!%p340_p2), 56   ;;  %s3001_s12 = smov (!%p340_p2), 64   ;;  %vm1170_vm13 = vcmask (!%p340_p2), 457728   ;;  %vm1317_vm15 = vcmask (!%p340_p2), 146432  }
   0xb   : > { %v3089_v7 = vsub.f32 (!%p340_p2), %v479_v3, %v3084_v6  ;;  %vm1032_vm7 = vmor (!%p340_p2), %vm1031_vm4, %vm1030_vm6  ;;  %s3002_s13 = smov (!%p340_p2), 124   ;;  %s3003_s14 = smov (!%p340_p2), 60   ;;  %vm1144_vm3 = vcmask (!%p340_p2), 982016   ;;  %vm1259_vm5 = vcmask (!%p340_p2), 490496   ;;  %vm1157_vm6 = vcmask (!%p340_p2), 523264  }
   0xc   : > { %1033 = vst.msk [vmem:[#allocation2] sm:$0xff] (!%p340_p2), %vm1032_vm7, %v2995_v2  ;;  %vm1078_vm9 = vmor (!%p340_p2), %vm1027_vm2, %vm1077_vm8  ;;  %vm1236_vm7 = vcmask (!%p340_p2), 1014784   ;;  %vm1301_vm8 = vcmask (!%p340_p2), 1045504  }
   0xd   : > { %v556_v11 = vand.u32 (!%p340_p2), 4294901760, %v3089_v7  ;;  %vm3206_vm12 = vmor (!%p340_p2), %vm1079_vm10, %vm1078_vm9  ;;  %vm1298_vm9 = vcmask (!%p340_p2), 1043456   ;;  %vm421_vm10 = vcmask (!%p340_p2), 15360  }
   0xf   : > { %s3569_s20 = smov (!%p379_p3, %s2769_s20), 1  ;;  %v557_v23 = vsub.f32 %v3089_v7, %v556_v11 }
  0x10   : > { %s2794_s24 = sshll.u32 %s3569_s20, 6 }
  0x11   : > { %s383_s27 = scalar_lea.vmem %s3554_s0, %s2794_s24  ;;  %v558_v35 = vand.u32 4294901760, %v557_v23  ;;  %s388_s21 = scalar_lea.vmem %s3565_s11, %s2794_s24 }
  0x12   : > { %v3096_v8 = vld [vmem:[%s383_s27 + $0x8] sm:$0xff]  ;;  %v3098_v9 = vld [vmem:[%s383_s27 + $0x18] sm:$0xff]  ;;  %v3100_v10 = vld [vmem:[%s383_s27] sm:$0xff] }
  0x13   : > { %v481_v12 = vand.u32 4294901760, %v3096_v8  ;;  %v485_v13 = vand.u32 4294901760, %v3098_v9  ;;  %v3105_v14 = vld [vmem:[%s383_s27 + $0x10] sm:$0xff]  ;;  %v483_v15 = vand.u32 4294901760, %v3100_v10  ;;  %v3108_v16 = vld [vmem:[%s383_s27 + $0x28] sm:$0xff]  ;;  %v3110_v17 = vld [vmem:[%s383_s27 + $0x38] sm:$0xff] }
  0x14   : > { %v487_v18 = vand.u32 4294901760, %v3105_v14  ;;  %v489_v19 = vand.u32 4294901760, %v3108_v16  ;;  %v493_v20 = vand.u32 4294901760, %v3110_v17  ;;  %v3115_v21 = vld [vmem:[%s383_s27 + $0x20] sm:$0xff]  ;;  %v3117_v22 = vld [vmem:[%s383_s27 + $0x30] sm:$0xff] }
  0x15   : > { %v3122_v24 = vpack.c.bf16 %v485_v13, %v481_v12  ;;  %v3125_v25 = vsub.f32 %v3096_v8, %v481_v12  ;;  %v3128_v26 = vsub.f32 %v3098_v9, %v485_v13  ;;  %v3131_v27 = vsub.f32 %v3100_v10, %v483_v15 }
  0x16   : > { %v3133_v28 = vpack.c.bf16 %v487_v18, %v483_v15  ;;  %v3136_v29 = vsub.f32 %v3105_v14, %v487_v18  ;;  %v3138_v30 = vpack.c.bf16 %v493_v20, %v489_v19  ;;  %v3141_v31 = vsub.f32 %v3108_v16, %v489_v19 }
  0x17   : > { %2797 = vmatprep.subr.bf16.mxu0 %v3122_v24  ;;  %v3145_v32 = vsub.f32 %v3110_v17, %v493_v20  ;;  %v491_v33 = vand.u32 4294901760, %v3115_v21  ;;  %v495_v34 = vand.u32 4294901760, %v3117_v22  ;;  %v567_v36 = vand.u32 4294901760, %v3125_v25 }
  0x18   : > { %2799 = vmatpush1.bf16.msra.mxu0 %v3133_v28  ;;  %v579_v37 = vand.u32 4294901760, %v3128_v26  ;;  %v573_v38 = vand.u32 4294901760, %v3131_v27  ;;  %v585_v39 = vand.u32 4294901760, %v3136_v29  ;;  %v591_v43 = vand.u32 4294901760, %v3141_v31 }
  0x19   : > { %2801 = vmatprep.subr.bf16.mxu0 %v3138_v30  ;;  %v3155_v40 = vpack.c.bf16 %v495_v34, %v491_v33  ;;  %v596_v41 = vsub.f32 %v3115_v21, %v491_v33  ;;  %v608_v42 = vsub.f32 %v3117_v22, %v495_v34  ;;  %v568_v44 = vsub.f32 %v3125_v25, %v567_v36 }
  0x1a   : > { %v580_v45 = vsub.f32 %v3128_v26, %v579_v37  ;;  %v574_v46 = vsub.f32 %v3131_v27, %v573_v38  ;;  %v586_v47 = vsub.f32 %v3136_v29, %v585_v39  ;;  %v592_v48 = vsub.f32 %v3141_v31, %v591_v43 }
  0x1b   : > { %v603_v49 = vand.u32 4294901760, %v3145_v32  ;;  %v597_v50 = vand.u32 4294901760, %v596_v41  ;;  %v609_v51 = vand.u32 4294901760, %v608_v42  ;;  %v569_v52 = vand.u32 4294901760, %v568_v44 }
  0x1c   : > { %2803 = vmatpush1.bf16.msra.mxu0 %v3155_v40  ;;  %v581_v53 = vand.u32 4294901760, %v580_v45  ;;  %v575_v54 = vand.u32 4294901760, %v574_v46  ;;  %v587_v55 = vand.u32 4294901760, %v586_v47  ;;  %v593_v56 = vand.u32 4294901760, %v592_v48 }
  0x1d   : > { %v604_v57 = vsub.f32 %v3145_v32, %v603_v49  ;;  %v598_v58 = vsub.f32 %v596_v41, %v597_v50  ;;  %v610_v59 = vsub.f32 %v608_v42, %v609_v51  ;;  %v2812_v4 = vpack.c.bf16 %v3128_v26, %v3125_v25 }
  0x1e   : > { %v2804_v60 = vpack.c.bf16 %v581_v53, %v569_v52  ;;  %v2806_v61 = vpack.c.bf16 %v587_v55, %v575_v54  ;;  %v2814_v5 = vpack.c.bf16 %v3136_v29, %v3131_v27  ;;  %v2816_v12 = vpack.c.bf16 %v3145_v32, %v3141_v31 }
  0x1f   : > { %559 = vmatmul.mubr.f32.vlgmr.msra.gmra.mrb[0].mxu0 %v558_v35  ;;  %v605_v62 = vand.u32 4294901760, %v604_v57  ;;  %v599_v63 = vand.u32 4294901760, %v598_v58  ;;  %v611_v0 = vand.u32 4294901760, %v610_v59  ;;  %v2818_v13 = vpack.c.bf16 %v608_v42, %v596_v41 }
  0x20   : > { %2805 = vmatprep.subr.bf16.mxu0 %v2804_v60  ;;  %669 = vmatprep.mubr.f32.mxu0 %v2995_v2  ;;  %v2828_v15 = vpack.c.bf16 %v579_v37, %v567_v36  ;;  %v2830_v18 = vpack.c.bf16 %v585_v39, %v573_v38  ;;  %v2832_v19 = vpack.c.bf16 %v603_v49, %v591_v43 }
  0x21   : > { %2807 = vmatpush1.bf16.msra.mxu0 %v2806_v61  ;;  %v2808_v1 = vpack.c.bf16 %v605_v62, %v593_v56  ;;  %v2810_v3 = vpack.c.bf16 %v611_v0, %v599_v63  ;;  %v2834_v20 = vpack.c.bf16 %v609_v51, %v597_v50  ;;  %v1311_v56 = vld [vmem:[%s3562_s8] sm:$0x3] }
  0x23   : > { %2809 = vmatprep.subr.bf16.mxu0 %v2808_v1 }
  0x25   : > { %2811 = vmatpush1.bf16.msra.mxu0 %v2810_v3 }
  0x26   : > { %2813 = vmatprep.subr.bf16.mxu0 %v2812_v4 }
  0x28   : > { %671 = vmatmul.mubr.f32.vlgmr.msra.gmra.mrb[0].mxu0 %v3084_v6 }
  0x29   : > { %2815 = vmatpush1.bf16.msra.mxu0 %v2814_v5  ;;  %757 = vmatprep.mubr.f32.mxu0 %v2995_v2 }
  0x2a   : > { %2817 = vmatprep.subr.bf16.mxu0 %v2816_v12 }
  0x2d   : > { %2819 = vmatpush1.bf16.msra.mxu0 %v2818_v13 }
  0x2e   : > { %2821 = vmatprep.subr.bf16.mxu0 %v3122_v24 }
  0x30   : > { %760 = vmatmul.mubr.f32.vlgmr.msra.gmra.mrb[0].mxu0 %v3089_v7  ;;  %v442_v7 = vlaneseq }
  0x31   : > { %2823 = vmatpush1.bf16.msra.mxu0 %v3133_v28  ;;  %838 = vmatprep.mubr.f32.mxu0 %v2995_v2 }
  0x32   : > { %2825 = vmatprep.subr.bf16.mxu0 %v3138_v30  ;;  %v1035_v60 = vand.u32 127, %v442_v7 }
  0x34   : > { %v1036_v63 = vadd.s32 128, %v1035_v60  ;;  %v1041_v5 = vand.u32 15, %v1035_v60 }
  0x35   : > { %2827 = vmatpush1.bf16.msra.mxu0 %v3155_v40 }
  0x36   : > { %2829 = vmatprep.subr.bf16.mxu0 %v2828_v15  ;;  %v1048_v1 = vand.u32 15, %v1036_v63 }
  0x38   : > { %842 = vmatmul.mubr.f32.vlgmr.msra.gmra.mrb[0].mxu0 %v556_v11  ;;  %v2997_v11 = vmov 1983009808   ;;  %v3246_v12 = vadd.s32 4, %v1048_v1 }
  0x39   : > { %2831 = vmatpush1.bf16.msra.mxu0 %v2830_v18  ;;  %936 = vmatprep.mubr.f32.mxu0 %v2995_v2  ;;  %v1065_v23 = vunpack.c.l.s4 %v2997_v11  ;;  %v3248_v18 = vadd.s32 4294967292, %v1048_v1  ;;  %v3254_v11 = vadd.s32 4, %v1041_v5 }
  0x3a   : > { %2833 = vmatprep.subr.bf16.mxu0 %v2832_v19  ;;  %vm1114_vm14 = vcmp.lt.s32.totalorder %v3246_v12, 16 }
  0x3b   : > { %v1066_v26 = vunpack.c.0.s8 %v1065_v23  ;;  %vm1086_vm0 = vcmp.ge.s32.totalorder %v3248_v18, 0  ;;  %vm1113_vm4 = vcmp.lt.s32.totalorder %v3254_v11, 16 }
  0x3d   : > { %2835 = vmatpush1.bf16.msra.mxu0 %v2834_v20 }
  0x3e   : > { %2837 = vmatprep.subr.bf16.mxu0 %v3122_v24 }
  0x40   : > { %938 = vmatmul.mubr.f32.vlgmr.msra.gmra.mrb[0].mxu0 %v3084_v6 }
  0x41   : > { %2839 = vmatpush1.bf16.msra.mxu0 %v3133_v28  ;;  %1016 = vmatprep.mubr.f32.mxu0 %v2995_v2 }
  0x42   : > { %2841 = vmatprep.subr.bf16.mxu0 %v3138_v30 }
  0x45   : > { %2843 = vmatpush1.bf16.msra.mxu0 %v3155_v40 }
  0x48   : > { %1018 = vmatmul.mubr.f32.vlgmr.msra.gmra.mrb[0].mxu0 %v3084_v6  ;;  %v3198_v6 = vshrl.u32 %v442_v7, 7  ;;  %v3252_v7 = vadd.s32 4294967292, %v1041_v5 }
  0x49   : > { %1397 = vmatprep.mubr.f32.mxu0 %v2995_v2 }
  0x4a   : > { %v3201_v32 = vsub.s32 %v1066_v26, %v3198_v6  ;;  %v1310_v26 = vld [vmem:[%s3561_s7] sm:$0x3]  ;;  %vm1085_vm2 = vcmp.ge.s32.totalorder %v3252_v7, 0 }
  0x88   : > { %v475_v24 = vpop.permute.xlu0 %474 }
 0x11b   : > { %v1019_v25 = vpop.f32.mrb[0].mxu0 }
 0x11c   : > { %v2892_v27 = vadd.f32 %v1019_v25, %v475_v24  ;;  %v1021_v28 = vpop.f32.mrb[1].mxu0 }
 0x11d   : > { %v2893_v29 = vadd.f32 %v1021_v28, %v475_v24 }
 0x11e   : > { %v1024_v30 = vmax.f32 %v2892_v27, 0.0 }
 0x11f   : > { %v1025_v31 = vmax.f32 %v2893_v29, 0.0  ;;  %v1319_v29 = vsel %vm1317_vm15, %v1310_v26, 0 }
 0x121   : > { %v1063_v33 = vcombine.low %v1024_v30, %v1025_v31 }
 0x123   : > { %v1070_v34 = vrot.slane %v1063_v33, %v3201_v32 }
 0x125   : > { %1071 = vrot.lane.b32.xlu0 %v1070_v34, %s2998_s28 }
 0x197   : > { %v1072_v35 = vpop.permute.xlu0 %1071 }
 0x198   : > { %v1073_v37 = vrot.slane %v1072_v35, 6 }
 0x19a   : > { %v1075_v38 = vsel %vm1074_vm11, %v1073_v37, %v1072_v35 }
 0x19b   : > { %1081 = vst.msk [vmem:[#allocation2] sm:$0x3f] %vm3206_vm12, %v1075_v38 }
 0x1a2   : > { %v1108_v39 = vld [vmem:[#allocation2] sm:$0x3f] }
 0x1a3   : > { %v1129_v40 = vrot.slane %v1108_v39, %v3201_v32  ;;  %v1122_v42 = vcombine.high %v1108_v39, %v1108_v39  ;;  %v1221_v44 = vcombine.low %v1108_v39, %v1108_v39  ;;  %v1191_v45 = vld [vmem:[#allocation2 + $0x2] sm:$0x3f] }
 0x1a4   : > { %v1200_v47 = vrot.slane %v1191_v45, %v3201_v32  ;;  %v1276_v48 = vcombine.low %v1191_v45, %v1191_v45  ;;  %v1193_v54 = vcombine.high %v1191_v45, %v1191_v45  ;;  %v2779_v19 = vld.sshfl [vmem:[#allocation2 + $0x2] sm:$0x33 pattern:$0x76325410] }
 0x1a5   : > { %1138 = vrot.lane.b32.xlu1 %v1129_v40, %s2999_s29  ;;  %1164 = vrot.lane.b32.xlu0 %v1129_v40, %s3000_s30  ;;  %v1137_v41 = vcombine.high %v1129_v40, %v1129_v40  ;;  %v1136_v43 = vrot.slane %v1122_v42, %v3201_v32  ;;  %v1228_v46 = vrot.slane %v1221_v44, %v3201_v32  ;;  %v2778_v28 = vld.sshfl [vmem:[#allocation2] sm:$0x33 pattern:$0x76325410]  ;;  %v1189_v44 = vsel %vm1085_vm2, %v2779_v19, 0.0 }
 0x1a6   : > { %v1285_v49 = vcombine.low %v1200_v47, %v1200_v47  ;;  %v1283_v50 = vrot.slane %v1276_v48, %v3201_v32  ;;  %v1208_v51 = vcombine.high %v1200_v47, %v1200_v47  ;;  %v1207_v55 = vrot.slane %v1193_v54, %v3201_v32 }
 0x1a7   : > { %v1229_v52 = vcombine.high %v1228_v46, %v1228_v46  ;;  %v1186_v25 = vcombine.high %v2779_v19, %v2779_v19  ;;  %v1272_v5 = vrot.slane %v1189_v44, 4 }
 0x1a8   : > { %v1284_v53 = vcombine.low %v1283_v50, %v1283_v50 }
 0x1a9   : > { %1151 = vrot.lane.b32.xlu0 %v1129_v40, %s3001_s12  ;;  %1166 = vrot.lane.b32.xlu1 %v1137_v41, %s3000_s30  ;;  %v1190_v34 = vsel %vm1086_vm0, %v1186_v25, 0.0 }
 0x1aa   : > { %v1273_v42 = vrot.slane %v1190_v34, 4 }
 0x1ad   : > { %1234 = vrot.lane.b32.xlu0 %v1129_v40, %s3002_s13  ;;  %1168 = vrot.lane.b32.xlu1 %v1136_v43, %s3000_s30 }
 0x1b1   : > { %1253 = vrot.lane.b32.xlu0 %v1129_v40, %s3003_s14  ;;  %1142 = vrot.lane.b32.xlu1 %v1136_v43, %s2999_s29 }
 0x1b5   : > { %1140 = vrot.lane.b32.xlu0 %v1137_v41, %s2999_s29  ;;  %1155 = vrot.lane.b32.xlu1 %v1136_v43, %s3001_s12 }
 0x1b9   : > { %1153 = vrot.lane.b32.xlu0 %v1137_v41, %s3001_s12  ;;  %1255 = vrot.lane.b32.xlu1 %v1137_v41, %s3003_s14  ;;  %v3272_v41 = vand.u32 4294901760, %v1319_v29 }
 0x1bd   : > { %1257 = vrot.lane.b32.xlu0 %v1136_v43, %s3003_s14  ;;  %1230 = vrot.lane.b32.xlu1 %v1228_v46, %s3002_s13  ;;  %v1103_v43 = vcombine.high %v2778_v28, %v2778_v28 }
 0x1c1   : > { %1290 = vrot.lane.b32.xlu0 %v1285_v49, %s3002_s13  ;;  %1288 = vrot.lane.b32.xlu1 %v1283_v50, %s3002_s13 }
 0x1c5   : > { %1211 = vrot.lane.b32.xlu0 %v1208_v51, %s2999_s29  ;;  %1232 = vrot.lane.b32.xlu1 %v1229_v52, %s3002_s13 }
 0x1c9   : > { %1209 = vrot.lane.b32.xlu0 %v1200_v47, %s2999_s29  ;;  %1286 = vrot.lane.b32.xlu1 %v1284_v53, %s3002_s13 }
 0x1cd   : > { %1213 = vrot.lane.b32.xlu1 %v1207_v55, %s2999_s29 }
 0x1d1   : > { %1314 = vperm.xlu1 %2946, %v1311_v56   ;;  %v1106_v56 = vsel %vm1085_vm2, %v2778_v28, 0.0 }
 0x217   : > { %v1139_v57 = vpop.permute.xlu1 %1138  ;;  %v1165_v58 = vpop.permute.xlu0 %1164 }
 0x21b   : > { %v1152_v59 = vpop.permute.xlu0 %1151  ;;  %v1167_v61 = vpop.permute.xlu1 %1166 }
 0x21c   : > { %v1171_v35 = vsel %vm1170_vm13, %v1165_v58, %v1167_v61 }
 0x21d   : > { %v1175_v45 = vsel %vm1113_vm4, %v1171_v35, 0.0 }
 0x21e   : > { %v1266_v58 = vrot.slane %v1175_v45, 6 }
 0x21f   : > { %v3244_v62 = vpop.permute.xlu0 %1234  ;;  %v1169_v0 = vpop.permute.xlu1 %1168 }
 0x220   : > { %v1172_v20 = vsel %vm1170_vm13, %v1167_v61, %v1169_v0 }
 0x221   : > { %v1176_v27 = vsel %vm1114_vm14, %v1172_v20, 0.0 }
 0x222   : > { %v1267_v30 = vrot.slane %v1176_v27, 6 }
 0x223   : > { %v1254_v3 = vpop.permute.xlu0 %1253  ;;  %v1143_v4 = vpop.permute.xlu1 %1142 }
 0x227   : > { %v1141_v13 = vpop.permute.xlu0 %1140  ;;  %v1156_v15 = vpop.permute.xlu1 %1155 }
 0x228   : > { %v1145_v38 = vsel %vm1144_vm3, %v1139_v57, %v1141_v13  ;;  %v1146_v39 = vsel %vm1144_vm3, %v1141_v13, %v1143_v4  ;;  %v3291_v57 = vsub.f32 %v1319_v29, %v3272_v41  ;;  %v1107_v4 = vsel %vm1086_vm0, %v1103_v43, 0.0 }
 0x229   : > { %v1149_v50 = vsel %vm1113_vm4, %v1145_v38, 0.0  ;;  %v1150_v51 = vsel %vm1114_vm14, %v1146_v39, 0.0 }
 0x22a   : > { %v1243_v63 = vrot.slane %v1149_v50, 4  ;;  %v1244_v0 = vrot.slane %v1150_v51, 4  ;;  %v1400_v29 = vand.u32 4294901760, %v3291_v57 }
 0x22b   : > { %v1154_v23 = vpop.permute.xlu0 %1153  ;;  %v1256_v24 = vpop.permute.xlu1 %1255 }
 0x22c   : > { %v1158_v46 = vsel %vm1157_vm6, %v1152_v59, %v1154_v23  ;;  %v1159_v47 = vsel %vm1157_vm6, %v1154_v23, %v1156_v15  ;;  %v1260_v54 = vsel %vm1259_vm5, %v1254_v3, %v1256_v24 }
 0x22d   : > { %v1162_v59 = vsel %vm1085_vm2, %v1158_v46, 0.0  ;;  %v1163_v60 = vsel %vm1086_vm0, %v1159_v47, 0.0  ;;  %v1304_v13 = vsel %vm1026_vm1, %v1260_v54, %v1266_v58 }
 0x22e   : > { %v1249_v23 = vrot.slane %v1162_v59, 2 }
 0x22f   : > { %v1258_v31 = vpop.permute.xlu0 %1257  ;;  %v1231_v33 = vpop.permute.xlu1 %1230 }
 0x230   : > { %v1261_v37 = vsel %vm1259_vm5, %v1256_v24, %v1258_v31  ;;  %v1250_v24 = vrot.slane %v1163_v60, 2 }
 0x231   : > { %v1305_v40 = vsel %vm1026_vm1, %v1261_v37, %v1267_v30 }
 0x232   : > { %v1307_v52 = vsel %vm1298_vm9, %v1305_v40, %v1273_v42 }
 0x233   : > { %v1291_v48 = vpop.permute.xlu0 %1290  ;;  %v1289_v49 = vpop.permute.xlu1 %1288 }
 0x234   : > { %v1293_v53 = vsel %vm1236_vm7, %v1289_v49, %v1291_v48 }
 0x235   : > { %v1309_v55 = vsel %vm1301_vm8, %v1307_v52, %v1293_v53  ;;  %v1401_v52 = vsub.f32 %v3291_v57, %v1400_v29 }
 0x236   : > { %v1331_v61 = vand.u32 4294901760, %v1309_v55 }
 0x237   : > { %v1212_v1 = vpop.permute.xlu0 %1211  ;;  %v1233_v3 = vpop.permute.xlu1 %1232 }
 0x238   : > { %v1237_v15 = vsel %vm1236_vm7, %v1231_v33, %v1233_v3  ;;  %v1238_v19 = vsel %vm1236_vm7, %v1233_v3, %v3244_v62  ;;  %v3303_v20 = vsub.f32 %v1309_v55, %v1331_v61  ;;  %v1306_v33 = vsel %vm1298_vm9, %v1304_v13, %v1272_v5 }
 0x239   : > { %v1296_v25 = vsel %vm1026_vm1, %v1106_v56, %v1237_v15  ;;  %v1297_v26 = vsel %vm1026_vm1, %v1107_v4, %v1238_v19 }
 0x23a   : > { %v1299_v27 = vsel %vm1298_vm9, %v1296_v25, %v1243_v63  ;;  %v1300_v28 = vsel %vm1298_vm9, %v1297_v26, %v1244_v0  ;;  %v1423_v35 = vand.u32 4294901760, %v3303_v20 }
 0x23b   : > { %v1302_v30 = vsel %vm1301_vm8, %v1299_v27, %v1249_v23  ;;  %v1210_v31 = vpop.permute.xlu0 %1209  ;;  %v1287_v62 = vpop.permute.xlu1 %1286  ;;  %v1303_v34 = vsel %vm1301_vm8, %v1300_v28, %v1250_v24 }
 0x23c   : > { %v1215_v37 = vsel %vm1144_vm3, %v1210_v31, %v1212_v1  ;;  %v1292_v38 = vsel %vm1236_vm7, %v1287_v62, %v1289_v49  ;;  %v1329_v39 = vand.u32 4294901760, %v1302_v30  ;;  %v1327_v40 = vand.u32 4294901760, %v1303_v34 }
 0x23d   : > { %v1219_v42 = vsel %vm1113_vm4, %v1215_v37, 0.0  ;;  %v1308_v43 = vsel %vm1301_vm8, %v1306_v33, %v1292_v38  ;;  %v1424_v49 = vsub.f32 %v3303_v20, %v1423_v35 }
 0x23e   : > { %v1322_v44 = vsel %vm1026_vm1, %v1219_v42, 0  ;;  %v1333_v45 = vand.u32 4294901760, %v1308_v43  ;;  %v3320_v46 = vpack.c.bf16 %v1331_v61, %v1327_v40  ;;  %v1410_v47 = vsub.f32 %v1303_v34, %v1327_v40 }
 0x23f   : > { %v3322_v48 = vand.u32 4294901760, %v1322_v44  ;;  %v1214_v50 = vpop.permute.xlu1 %1213  ;;  %v1416_v51 = vsub.f32 %v1302_v30, %v1329_v39  ;;  %v1425_v25 = vand.u32 4294901760, %v1424_v49 }
 0x240   : > { %v2846_v53 = vpack.c.bf16 %v1333_v45, %v1329_v39  ;;  %v1428_v54 = vsub.f32 %v1308_v43, %v1333_v45  ;;  %v1216_v55 = vsel %vm1144_vm3, %v1212_v1, %v1214_v50  ;;  %2845 = vmatprep.subr.bf16.mxu0 %v3320_v46  ;;  %v2852_v56 = vpack.c.bf16 %v3303_v20, %v1410_v47 }
 0x241   : > { %v1220_v58 = vsel %vm1114_vm14, %v1216_v55, 0.0  ;;  %v1417_v59 = vand.u32 4294901760, %v1416_v51  ;;  %v1411_v60 = vand.u32 4294901760, %v1410_v47  ;;  %v1440_v61 = vsub.f32 %v1322_v44, %v3322_v48 }
 0x242   : > { %v1429_v63 = vand.u32 4294901760, %v1428_v54  ;;  %v1325_v0 = vsel %vm1026_vm1, %v1220_v58, 0  ;;  %2847 = vmatpush1.bf16.msra.mxu0 %v2846_v53  ;;  %2853 = vmatprep.subr.bf16.mxu1 %v2852_v56  ;;  %v2854_v3 = vpack.c.bf16 %v1428_v54, %v1416_v51  ;;  %v1402_v1 = vand.u32 4294901760, %v1401_v52 }
 0x243   : > { %v1335_v4 = vand.u32 4294901760, %v1325_v0  ;;  %v1412_v5 = vsub.f32 %v1410_v47, %v1411_v60  ;;  %v1418_v13 = vsub.f32 %v1416_v51, %v1417_v59  ;;  %v1441_v19 = vand.u32 4294901760, %v1440_v61 }
 0x244   : > { %v1430_v15 = vsub.f32 %v1428_v54, %v1429_v63  ;;  %2855 = vmatpush1.bf16.msra.mxu1 %v2854_v3  ;;  %v2860_v38 = vpack.c.bf16 %v1423_v35, %v1411_v60  ;;  %v2862_v39 = vpack.c.bf16 %v1429_v63, %v1417_v59 }
 0x245   : > { %1336 = vmatprep.subr.mxu0 %v1335_v4  ;;  %v1434_v23 = vsub.f32 %v1325_v0, %v1335_v4  ;;  %v1413_v24 = vand.u32 4294901760, %v1412_v5  ;;  %v1419_v26 = vand.u32 4294901760, %v1418_v13  ;;  %v1442_v33 = vsub.f32 %v1440_v61, %v1441_v19 }
 0x246   : > { %1338 = vmatpush1.msra.mxu0 %v3322_v48  ;;  %v1431_v27 = vand.u32 4294901760, %v1430_v15  ;;  %v397_v15 = vadd.f32 %v3096_v8, %v3100_v10 }
 0x247   : > { %1525 = vmatprep.subr.mxu1 %v1434_v23  ;;  %v2848_v28 = vpack.c.bf16 %v1425_v25, %v1413_v24  ;;  %1403 = vmatmul.mubr.f32.vlgmr.msra.gmra.mrb[2].mxu0 %v1402_v1  ;;  %v1435_v30 = vand.u32 4294901760, %v1434_v23  ;;  %v1443_v37 = vand.u32 4294901760, %v1442_v33 }
 0x248   : > { %1528 = vmatpush1.msra.mxu1 %v1440_v61  ;;  %v2850_v31 = vpack.c.bf16 %v1431_v27, %v1419_v26  ;;  %1503 = vmatprep.mubr.f32.mxu0 %v2995_v2 }
 0x249   : > { %2849 = vmatprep.subr.bf16.mxu0 %v2848_v28  ;;  %1590 = vmatmul.mubr.f32.vlgmr.msra.gmra.mrb[0].mxu1 %v3291_v57  ;;  %v1436_v62 = vsub.f32 %v1434_v23, %v1435_v30  ;;  %v406_v23 = vadd.f32 %v3110_v17, %v3117_v22 }
 0x24a   : > { %2857 = vmatprep.subr.bf16.mxu1 %v3320_v46  ;;  %2851 = vmatpush1.bf16.msra.mxu0 %v2850_v31 }
 0x24b   : > { %2859 = vmatpush1.bf16.msra.mxu1 %v2846_v53  ;;  %v1437_v34 = vand.u32 4294901760, %v1436_v62  ;;  %1666 = vmatprep.mubr.f32.mxu1 %v2995_v2 }
 0x24c   : > { %1605 = vmatprep.subr.mxu1 %v1335_v4 }
 0x24d   : > { %1438 = vmatprep.subr.mxu0 %v1437_v34 }
 0x24e   : > { %1444 = vmatpush1.msra.mxu0 %v1443_v37 }
 0x24f   : > { %1607 = vmatpush1.msra.mxu1 %v3322_v48  ;;  %1505 = vmatmul.mubr.f32.vlgmr.msra.gmra.mrb[2].mxu0 %v3272_v41 }
 0x250   : > { %2861 = vmatprep.subr.bf16.mxu1 %v2860_v38 }
 0x251   : > { %1670 = vmatmul.mubr.f32.vlgmr.msra.gmra.mrb[0].mxu1 %v1400_v29  ;;  %v1315_v29 = vpop.permute.xlu1 %1314 }
 0x252   : > { %2863 = vmatpush1.bf16.msra.mxu1 %v2862_v39  ;;  %1758 = vmatprep.mubr.f32.mxu1 %v2995_v2 }
 0x253   : > { %1695 = vmatprep.subr.mxu1 %v1435_v30 }
 0x256   : > { %1699 = vmatpush1.msra.mxu1 %v1441_v19  ;;  %v403_v19 = vadd.f32 %v3108_v16, %v3115_v21  ;;  %v2782_v16 = vld [vmem:[%s3561_s7 + $0x2] sm:$0x3] }
 0x257   : > { %2865 = vmatprep.subr.bf16.mxu1 %v3320_v46 }
 0x259   : > { %1760 = vmatmul.mubr.f32.vlgmr.msra.gmra.mrb[0].mxu1 %v3272_v41 }
 0x25a   : > { %2867 = vmatpush1.bf16.msra.mxu1 %v2846_v53  ;;  %1836 = vmatprep.mubr.f32.mxu1 %v2995_v2 }
 0x25b   : > { %1775 = vmatprep.subr.mxu1 %v1335_v4 }
 0x25e   : > { %1777 = vmatpush1.msra.mxu1 %v3322_v48 }
 0x261   : > { %1838 = vmatmul.mubr.f32.vlgmr.msra.gmra.mrb[0].mxu1 %v3272_v41 }
 0x262   : > { %2147 = vmatprep.mubr.f32.mxu1 %v2995_v2 }
 0x322   : > { %v1506_v57 = vpop.f32.mrb[2].mxu0 }
 0x323   : > { %v1508_v20 = vpop.f32.mrb[3].mxu0  ;;  %v2894_v35 = vadd.f32 %v1506_v57, %v1315_v29 }
 0x324   : > { %v2896_v40 = vadd.f32 %v1508_v20, %v1315_v29 }
 0x334   : > { %v1839_v42 = vpop.f32.mrb[0].mxu1 }
 0x335   : > { %v2895_v43 = vadd.f32 %v2894_v35, %v1839_v42  ;;  %v1841_v44 = vpop.f32.mrb[1].mxu1 }
 0x336   : > { %v2897_v45 = vadd.f32 %v2896_v40, %v1841_v44 }
 0x337   : > { %v1844_v46 = vmax.f32 %v2895_v43, 0.0 }
 0x338   : > { %v1845_v47 = vmax.f32 %v2897_v45, 0.0 }
 0x33a   : > { %v1848_v50 = vcombine.low %v1844_v46, %v1845_v47 }
 0x33c   : > { %v1855_v51 = vrot.slane %v1848_v50, %v3201_v32 }
 0x33e   : > { %1856 = vrot.lane.b32.xlu0 %v1855_v51, %s2998_s28 }
 0x3b0   : > { %v1857_v48 = vpop.permute.xlu0 %1856 }
 0x3b1   : > { %v1858_v41 = vrot.slane %v1857_v48, 6 }
 0x3b3   : > { %v1859_v49 = vsel %vm1074_vm11, %v1858_v41, %v1857_v48 }
 0x3b4   : > { %1861 = vst.msk [vmem:[#allocation2] sm:$0x3f] %vm3206_vm12, %v1859_v49 }
 0x3bb   : > { %v1876_v52 = vld [vmem:[#allocation2] sm:$0x3f] }
 0x3bc   : > { %v1885_v53 = vrot.slane %v1876_v52, %v3201_v32  ;;  %v1878_v54 = vcombine.high %v1876_v52, %v1876_v52  ;;  %v1974_v56 = vcombine.low %v1876_v52, %v1876_v52  ;;  %v1944_v58 = vld [vmem:[#allocation2 + $0x2] sm:$0x3f] }
 0x3bd   : > { %v2027_v60 = vcombine.low %v1944_v58, %v1944_v58  ;;  %v1953_v0 = vrot.slane %v1944_v58, %v3201_v32  ;;  %v1946_v5 = vcombine.high %v1944_v58, %v1944_v58  ;;  %v2781_v17 = vld.sshfl [vmem:[#allocation2 + $0x2] sm:$0x33 pattern:$0x76325410] }
 0x3be   : > { %1894 = vrot.lane.b32.xlu0 %v1885_v53, %s2999_s29  ;;  %1918 = vrot.lane.b32.xlu1 %v1885_v53, %s3000_s30  ;;  %v1892_v55 = vrot.slane %v1878_v54, %v3201_v32  ;;  %v1893_v36 = vcombine.high %v1885_v53, %v1885_v53  ;;  %v1981_v59 = vrot.slane %v1974_v56, %v3201_v32  ;;  %v1942_v45 = vsel %vm1085_vm2, %v2781_v17, 0.0 }
 0x3bf   : > { %v2034_v61 = vrot.slane %v2027_v60, %v3201_v32  ;;  %v2036_v3 = vcombine.low %v1953_v0, %v1953_v0  ;;  %v1961_v1 = vcombine.high %v1953_v0, %v1953_v0  ;;  %v1960_v13 = vrot.slane %v1946_v5, %v3201_v32 }
 0x3c0   : > { %v1982_v63 = vcombine.high %v1981_v59, %v1981_v59  ;;  %v400_v32 = vadd.f32 %v3098_v9, %v3105_v14  ;;  %v2069_v9 = vsel %vm1317_vm15, %v2782_v16, 0  ;;  %v2780_v14 = vld.sshfl [vmem:[#allocation2] sm:$0x33 pattern:$0x76325410]  ;;  %v1939_v34 = vcombine.high %v2781_v17, %v2781_v17 }
 0x3c1   : > { %v2035_v4 = vcombine.low %v2034_v61, %v2034_v61  ;;  %v3403_v39 = vand.u32 4294901760, %v2069_v9  ;;  %v1871_v29 = vcombine.high %v2780_v14, %v2780_v14  ;;  %v1874_v49 = vsel %vm1085_vm2, %v2780_v14, 0.0 }
 0x3c2   : > { %1906 = vrot.lane.b32.xlu1 %v1885_v53, %s3001_s12  ;;  %1922 = vrot.lane.b32.xlu0 %v1892_v55, %s3000_s30  ;;  %v1943_v44 = vsel %vm1086_vm0, %v1939_v34, 0.0 }
 0x3c3   : > { %v3420_v48 = vsub.f32 %v2069_v9, %v3403_v39  ;;  %v1875_v52 = vsel %vm1086_vm0, %v1871_v29, 0.0 }
 0x3c6   : > { %1987 = vrot.lane.b32.xlu1 %v1885_v53, %s3002_s13  ;;  %1898 = vrot.lane.b32.xlu0 %v1892_v55, %s2999_s29 }
 0x3ca   : > { %2005 = vrot.lane.b32.xlu1 %v1885_v53, %s3003_s14  ;;  %1910 = vrot.lane.b32.xlu0 %v1892_v55, %s3001_s12 }
 0x3ce   : > { %1920 = vrot.lane.b32.xlu1 %v1893_v36, %s3000_s30  ;;  %2007 = vrot.lane.b32.xlu0 %v1893_v36, %s3003_s14 }
 0x3d2   : > { %1896 = vrot.lane.b32.xlu1 %v1893_v36, %s2999_s29  ;;  %1983 = vrot.lane.b32.xlu0 %v1981_v59, %s3002_s13 }
 0x3d6   : > { %1908 = vrot.lane.b32.xlu1 %v1893_v36, %s3001_s12  ;;  %2039 = vrot.lane.b32.xlu0 %v2034_v61, %s3002_s13  ;;  %v2023_v36 = vrot.slane %v1942_v45, 4 }
 0x3da   : > { %2009 = vrot.lane.b32.xlu1 %v1892_v55, %s3003_s14  ;;  %1985 = vrot.lane.b32.xlu0 %v1982_v63, %s3002_s13  ;;  %v2024_v55 = vrot.slane %v1943_v44, 4 }
 0x3de   : > { %2041 = vrot.lane.b32.xlu1 %v2036_v3, %s3002_s13  ;;  %2037 = vrot.lane.b32.xlu0 %v2035_v4, %s3002_s13 }
 0x3e2   : > { %1964 = vrot.lane.b32.xlu1 %v1961_v1, %s2999_s29  ;;  %1966 = vrot.lane.b32.xlu0 %v1960_v13, %s2999_s29 }
 0x3e6   : > { %1962 = vrot.lane.b32.xlu1 %v1953_v0, %s2999_s29 }
 0x401   : > { %398 = vadd.xlane.f32.xlu0 %v397_v15 }
 0x405   : > { %404 = vadd.xlane.f32.xlu0 %v403_v19 }
 0x409   : > { %407 = vadd.xlane.f32.xlu0 %v406_v23  ;;  %v2150_v23 = vand.u32 4294901760, %v3420_v48 }
 0x40a   : > { %401 = vadd.xlane.f32.xlu1 %v400_v32 }
 0x40b   : > { %v2151_v34 = vsub.f32 %v3420_v48, %v2150_v23 }
 0x430   : > { %v1895_v24 = vpop.permute.xlu0 %1894  ;;  %v1919_v25 = vpop.permute.xlu1 %1918 }
 0x434   : > { %v1907_v26 = vpop.permute.xlu1 %1906  ;;  %v1923_v27 = vpop.permute.xlu0 %1922 }
 0x438   : > { %v1988_v28 = vpop.permute.xlu1 %1987  ;;  %v1899_v30 = vpop.permute.xlu0 %1898 }
 0x43c   : > { %v2006_v8 = vpop.permute.xlu1 %2005  ;;  %v1911_v10 = vpop.permute.xlu0 %1910 }
 0x440   : > { %v1921_v21 = vpop.permute.xlu1 %1920  ;;  %v2008_v31 = vpop.permute.xlu0 %2007 }
 0x441   : > { %v1924_v22 = vsel %vm1170_vm13, %v1919_v25, %v1921_v21  ;;  %v1925_v37 = vsel %vm1170_vm13, %v1921_v21, %v1923_v27  ;;  %v2011_v53 = vsel %vm1259_vm5, %v2006_v8, %v2008_v31 }
 0x442   : > { %v1928_v38 = vsel %vm1113_vm4, %v1924_v22, 0.0  ;;  %v1929_v35 = vsel %vm1114_vm14, %v1925_v37, 0.0 }
 0x443   : > { %v2017_v40 = vrot.slane %v1928_v38, 6  ;;  %v2018_v56 = vrot.slane %v1929_v35, 6 }
 0x444   : > { %v1897_v33 = vpop.permute.xlu1 %1896  ;;  %v1984_v62 = vpop.permute.xlu0 %1983 }
 0x445   : > { %v1900_v57 = vsel %vm1144_vm3, %v1895_v24, %v1897_v33  ;;  %v1901_v20 = vsel %vm1144_vm3, %v1897_v33, %v1899_v30  ;;  %v2053_v58 = vsel %vm1026_vm1, %v2011_v53, %v2017_v40 }
 0x446   : > { %v1904_v46 = vsel %vm1113_vm4, %v1900_v57, 0.0  ;;  %v1905_v47 = vsel %vm1114_vm14, %v1901_v20, 0.0 }
 0x447   : > { %v1995_v59 = vrot.slane %v1904_v46, 4  ;;  %v1996_v60 = vrot.slane %v1905_v47, 4 }
 0x448   : > { %v1909_v42 = vpop.permute.xlu1 %1908  ;;  %v2040_v43 = vpop.permute.xlu0 %2039 }
 0x449   : > { %v1912_v50 = vsel %vm1157_vm6, %v1907_v26, %v1909_v42  ;;  %v1913_v51 = vsel %vm1157_vm6, %v1909_v42, %v1911_v10  ;;  %v2055_v26 = vsel %vm1298_vm9, %v2053_v58, %v2023_v36 }
 0x44a   : > { %v1916_v41 = vsel %vm1085_vm2, %v1912_v50, 0.0  ;;  %v1917_v54 = vsel %vm1086_vm0, %v1913_v51, 0.0 }
 0x44b   : > { %v2001_v0 = vrot.slane %v1916_v41, 2  ;;  %v2002_v5 = vrot.slane %v1917_v54, 2  ;;  %v2152_v54 = vand.u32 4294901760, %v2151_v34 }
 0x44c   : > { %v2010_v61 = vpop.permute.xlu1 %2009  ;;  %v1986_v63 = vpop.permute.xlu0 %1985 }
 0x44d   : > { %v2012_v7 = vsel %vm1259_vm5, %v2008_v31, %v2010_v61  ;;  %v1989_v3 = vsel %vm1236_vm7, %v1984_v62, %v1986_v63  ;;  %v1990_v4 = vsel %vm1236_vm7, %v1986_v63, %v1988_v28 }
 0x44e   : > { %v2054_v18 = vsel %vm1026_vm1, %v2012_v7, %v2018_v56  ;;  %v2047_v1 = vsel %vm1026_vm1, %v1874_v49, %v1989_v3  ;;  %v2048_v13 = vsel %vm1026_vm1, %v1875_v52, %v1990_v4 }
 0x44f   : > { %v2049_v15 = vsel %vm1298_vm9, %v2047_v1, %v1995_v59  ;;  %v2050_v19 = vsel %vm1298_vm9, %v2048_v13, %v1996_v60  ;;  %v2056_v25 = vsel %vm1298_vm9, %v2054_v18, %v2024_v55 }
 0x450   : > { %v2051_v32 = vsel %vm1301_vm8, %v2049_v15, %v2001_v0  ;;  %v2042_v24 = vpop.permute.xlu1 %2041  ;;  %v2038_v27 = vpop.permute.xlu0 %2037  ;;  %v2052_v28 = vsel %vm1301_vm8, %v2050_v19, %v2002_v5 }
 0x451   : > { %v2044_v30 = vsel %vm1236_vm7, %v2040_v43, %v2042_v24  ;;  %v2043_v8 = vsel %vm1236_vm7, %v2038_v27, %v2040_v43  ;;  %v2079_v10 = vand.u32 4294901760, %v2051_v32  ;;  %v2077_v16 = vand.u32 4294901760, %v2052_v28  ;;  %v414_v27 = vld [vmem:[%s3555_s1 + $0x8] sm:$0xff] }
 0x452   : > { %v2058_v21 = vsel %vm1301_vm8, %v2056_v25, %v2044_v30  ;;  %v2057_v31 = vsel %vm1301_vm8, %v2055_v26, %v2043_v8 }
 0x453   : > { %v2081_v17 = vand.u32 4294901760, %v2058_v21  ;;  %v2083_v22 = vand.u32 4294901760, %v2057_v31  ;;  %v3449_v9 = vsub.f32 %v2051_v32, %v2079_v10  ;;  %v3451_v14 = vsub.f32 %v2052_v28, %v2077_v16 }
 0x454   : > { %v1965_v33 = vpop.permute.xlu1 %1964  ;;  %v1967_v62 = vpop.permute.xlu0 %1966 }
 0x455   : > { %v2172_v37 = vsub.f32 %v2058_v21, %v2081_v17  ;;  %v3456_v38 = vpack.c.bf16 %v2083_v22, %v2079_v10  ;;  %v2178_v57 = vsub.f32 %v2057_v31, %v2083_v22  ;;  %v1969_v20 = vsel %vm1144_vm3, %v1965_v33, %v1967_v62 }
 0x456   : > { %v1973_v29 = vsel %vm1114_vm14, %v1969_v20, 0.0  ;;  %v2868_v35 = vpack.c.bf16 %v2081_v17, %v2077_v16  ;;  %v2161_v40 = vand.u32 4294901760, %v3451_v14  ;;  %v2167_v42 = vand.u32 4294901760, %v3449_v9 }
 0x457   : > { %v2179_v43 = vand.u32 4294901760, %v2178_v57  ;;  %v2075_v44 = vsel %vm1026_vm1, %v1973_v29, 0  ;;  %v2173_v45 = vand.u32 4294901760, %v2172_v37  ;;  %v2876_v1 = vpack.c.bf16 %v2172_v37, %v3451_v14 }
 0x458   : > { %v2085_v46 = vand.u32 4294901760, %v2075_v44  ;;  %2869 = vmatprep.subr.bf16.mxu1 %v2868_v35  ;;  %v1963_v47 = vpop.permute.xlu1 %1962  ;;  %v2162_v50 = vsub.f32 %v3451_v14, %v2161_v40  ;;  %v2168_v51 = vsub.f32 %v3449_v9, %v2167_v42  ;;  %v2878_v13 = vpack.c.bf16 %v2178_v57, %v3449_v9 }
 0x459   : > { %v2180_v41 = vsub.f32 %v2178_v57, %v2179_v43  ;;  %v1968_v12 = vsel %vm1144_vm3, %v1963_v47, %v1965_v33  ;;  %2871 = vmatpush1.bf16.msra.mxu1 %v3456_v38  ;;  %v2174_v49 = vsub.f32 %v2172_v37, %v2173_v45  ;;  %v2884_v15 = vpack.c.bf16 %v2173_v45, %v2161_v40  ;;  %v439_v45 = vld [vmem:[%s3557_s3 + $0x8] sm:$0xff] }
 0x45a   : > { %v2184_v52 = vsub.f32 %v2075_v44, %v2085_v46  ;;  %v1972_v53 = vsel %vm1113_vm4, %v1968_v12, 0.0  ;;  %2086 = vmatprep.subr.mxu1 %v2085_v46  ;;  %v2163_v55 = vand.u32 4294901760, %v2162_v50  ;;  %v2169_v58 = vand.u32 4294901760, %v2168_v51  ;;  %v441_v50 = vld [vmem:[%s3557_s3 + $0x18] sm:$0xff]  ;;  %v440_v51 = vld [vmem:[%s3557_s3 + $0x10] sm:$0xff] }
 0x45b   : > { %v2072_v36 = vsel %vm1026_vm1, %v1972_v53, 0  ;;  %v2175_v56 = vand.u32 4294901760, %v2174_v49  ;;  %v2181_v59 = vand.u32 4294901760, %v2180_v41  ;;  %v2886_v19 = vpack.c.bf16 %v2179_v43, %v2167_v42 }
 0x45c   : > { %v2087_v60 = vand.u32 4294901760, %v2072_v36  ;;  %v2185_v61 = vand.u32 4294901760, %v2184_v52  ;;  %v444_v43 = vsub.s32 0, %v3198_v6 }
 0x45d   : > { %v2872_v63 = vpack.c.bf16 %v2175_v56, %v2163_v55  ;;  %v2874_v0 = vpack.c.bf16 %v2181_v59, %v2169_v58  ;;  %v2783_v56 = vld [vmem:[%s3562_s8 + $0x2] sm:$0x3]  ;;  %v2618_v58 = vld [vmem:[#allocation3] sm:$0x1]  ;;  %v2596_v59 = vld [vmem:[%s3563_s9] sm:$0x3] }
 0x45e   : > { %v2190_v7 = vsub.f32 %v2072_v36, %v2087_v60  ;;  %2088 = vmatpush1.msra.mxu1 %v2087_v60  ;;  %v2186_v3 = vsub.f32 %v2184_v52, %v2185_v61 }
 0x45f   : > { %2153 = vmatmul.mubr.f32.vlgmr.msra.gmra.mrb[2].mxu1 %v2152_v54  ;;  %2873 = vmatprep.subr.bf16.mxu1 %v2872_v63 }
 0x460   : > { %v2191_v4 = vand.u32 4294901760, %v2190_v7  ;;  %2875 = vmatpush1.bf16.msra.mxu1 %v2874_v0  ;;  %v2187_v11 = vand.u32 4294901760, %v2186_v3  ;;  %2253 = vmatprep.mubr.f32.mxu1 %v2995_v2 }
 0x462   : > { %2188 = vmatprep.subr.mxu1 %v2187_v11  ;;  %v2192_v5 = vsub.f32 %v2190_v7, %v2191_v4  ;;  %v464_v11 = vld [vmem:[%s3558_s4 + $0x10] sm:$0xff] }
 0x464   : > { %v2193_v18 = vand.u32 4294901760, %v2192_v5 }
 0x466   : > { %2194 = vmatpush1.msra.mxu1 %v2193_v18 }
 0x467   : > { %2255 = vmatmul.mubr.f32.vlgmr.msra.gmra.mrb[2].mxu1 %v3403_v39  ;;  %2877 = vmatprep.subr.bf16.mxu1 %v2876_v1 }
 0x468   : > { %2879 = vmatpush1.bf16.msra.mxu1 %v2878_v13  ;;  %2337 = vmatprep.mubr.f32.mxu1 %v2995_v2 }
 0x469   : > { %2275 = vmatprep.subr.mxu1 %v2184_v52 }
 0x46c   : > { %2278 = vmatpush1.msra.mxu1 %v2190_v7 }
 0x46d   : > { %2881 = vmatprep.subr.bf16.mxu1 %v2868_v35 }
 0x46f   : > { %2340 = vmatmul.mubr.f32.vlgmr.msra.gmra.mrb[2].mxu1 %v3420_v48 }
 0x470   : > { %2883 = vmatpush1.bf16.msra.mxu1 %v3456_v38  ;;  %2416 = vmatprep.mubr.f32.mxu1 %v2995_v2 }
 0x471   : > { %2355 = vmatprep.subr.mxu1 %v2085_v46 }
 0x474   : > { %2357 = vmatpush1.msra.mxu1 %v2087_v60 }
 0x475   : > { %2885 = vmatprep.subr.bf16.mxu1 %v2884_v15 }
 0x477   : > { %2420 = vmatmul.mubr.f32.vlgmr.msra.gmra.mrb[2].mxu1 %v2150_v23  ;;  %v413_v23 = vld [vmem:[%s3555_s1] sm:$0xff] }
 0x478   : > { %2887 = vmatpush1.bf16.msra.mxu1 %v2886_v19  ;;  %2508 = vmatprep.mubr.f32.mxu1 %v2995_v2 }
 0x479   : > { %2445 = vmatprep.subr.mxu1 %v2185_v61  ;;  %v462_v61 = vld [vmem:[%s3558_s4] sm:$0xff] }
 0x47c   : > { %2449 = vmatpush1.msra.mxu1 %v2191_v4  ;;  %v465_v4 = vld [vmem:[%s3558_s4 + $0x18] sm:$0xff] }
 0x47d   : > { %2889 = vmatprep.subr.bf16.mxu1 %v2868_v35  ;;  %v435_v35 = vld [vmem:[%s3556_s2] sm:$0x1] }
 0x47f   : > { %2510 = vmatmul.mubr.f32.vlgmr.msra.gmra.mrb[2].mxu1 %v3403_v39 }
 0x480   : > { %2891 = vmatpush1.bf16.msra.mxu1 %v3456_v38  ;;  %2586 = vmatprep.mubr.f32.mxu1 %v2995_v2  ;;  %v415_v2 = vld [vmem:[%s3555_s1 + $0x10] sm:$0xff] }
 0x481   : > { %2525 = vmatprep.subr.mxu1 %v2085_v46  ;;  %v438_v46 = vld [vmem:[%s3557_s3] sm:$0xff] }
 0x484   : > { %2527 = vmatpush1.msra.mxu1 %v2087_v60  ;;  %v463_v60 = vld [vmem:[%s3558_s4 + $0x8] sm:$0xff] }
 0x487   : > { %2588 = vmatmul.mubr.f32.vlgmr.msra.gmra.mrb[2].mxu1 %v3403_v39  ;;  %v416_v39 = vld [vmem:[%s3555_s1 + $0x18] sm:$0xff] }
 0x48e   : > { %v399_v32 = vpop.xlane.xlu0 %398 }
 0x48f   : > { %v409_v48 = vmul.f32 0.00390625, %v399_v32 }
 0x491   : > { %v417_v8 = vmul.f32 %v413_v23, %v409_v48 }
 0x492   : > { %v405_v24 = vpop.xlane.xlu0 %404 }
 0x493   : > { %v411_v25 = vmul.f32 0.00390625, %v405_v24  ;;  %v422_v17 = vsel %vm421_vm10, %v417_v8, 0.0 }
 0x495   : > { %v419_v21 = vmul.f32 %v415_v2, %v411_v25 }
 0x496   : > { %v408_v26 = vpop.xlane.xlu0 %407 }
 0x497   : > { %v402_v28 = vpop.xlane.xlu1 %401  ;;  %v412_v30 = vmul.f32 0.00390625, %v408_v26  ;;  %v425_v14 = vsel %vm421_vm10, %v419_v21, 0.0 }
 0x498   : > { %v410_v10 = vmul.f32 0.00390625, %v402_v28 }
 0x499   : > { %v420_v31 = vmul.f32 %v416_v39, %v412_v30 }
 0x49a   : > { %v418_v16 = vmul.f32 %v414_v27, %v410_v10 }
 0x49b   : > { %v427_v33 = vsel %vm421_vm10, %v420_v31, 0.0 }
 0x49c   : > { %v423_v22 = vsel %vm421_vm10, %v418_v16, 0.0 }
 0x49d   : > { %v424_v9 = vadd.f32 %v423_v22, %v422_v17 }
 0x49f   : > { %v426_v62 = vadd.f32 %v425_v14, %v424_v9 }
 0x4a1   : > { %v428_v34 = vadd.f32 %v427_v33, %v426_v62 }
 0x4a3   : > { %v429_v37 = vrot.slane %v428_v34, 4 }
 0x4a5   : > { %v430_v38 = vadd.f32 %v429_v37, %v428_v34 }
 0x4a7   : > { %v431_v57 = vrot.slane %v430_v38, 2 }
 0x4a9   : > { %v432_v20 = vadd.f32 %v431_v57, %v430_v38 }
 0x4ab   : > { %v433_v29 = vrot.slane %v432_v20, 1 }
 0x4ad   : > { %v434_v40 = vadd.f32 %v433_v29, %v432_v20 }
 0x4af   : > { %v436_v42 = vadd.f32 %v435_v35, %v434_v40 }
 0x4b1   : > { %v437_v44 = vmax.f32 %v436_v42, 0.0 }
 0x4b3   : > { %v445_v47 = vrot.slane %v437_v44, %v444_v43 }
 0x4b5   : > { %v447_v41 = vmul.f32 %v445_v47, %v439_v45  ;;  %v446_v12 = vmul.f32 %v445_v47, %v438_v46  ;;  %v449_v53 = vmul.f32 %v445_v47, %v441_v50  ;;  %v448_v54 = vmul.f32 %v445_v47, %v440_v51 }
 0x4b7   : > { %v453_v49 = vsel %vm421_vm10, %v447_v41, 0.0  ;;  %v450_v52 = vsel %vm421_vm10, %v446_v12, 0.0  ;;  %v459_v55 = vsel %vm421_vm10, %v449_v53, 0.0  ;;  %v456_v36 = vsel %vm421_vm10, %v448_v54, 0.0 }
 0x4b8   : > { %454 = vadd.xlane.f32.xlu0 %v453_v49  ;;  %451 = vadd.xlane.f32.xlu1 %v450_v52 }
 0x4bc   : > { %460 = vadd.xlane.f32.xlu0 %v459_v55  ;;  %457 = vadd.xlane.f32.xlu1 %v456_v36 }
 0x4cd   : > { %2065 = vperm.xlu1 %2946, %v2783_v56  }
 0x4d1   : > { %2621 = vperm.xlu1 %2946, %v2618_v58  }
 0x4d2   : > { %2599 = vperm.xlu0 %2945, %v2596_v59  }
 0x545   : > { %v455_v63 = vpop.xlane.xlu0 %454  ;;  %v452_v0 = vpop.xlane.xlu1 %451 }
 0x546   : > { %v467_v7 = vadd.f32 %v463_v60, %v455_v63  ;;  %v466_v3 = vadd.f32 %v462_v61, %v452_v0 }
 0x548   : > { %2637 = vperm.xlu0 %2945, %v467_v7   ;;  %2632 = vperm.xlu1 %2946, %v466_v3  }
 0x549   : > { %v461_v5 = vpop.xlane.xlu0 %460  ;;  %v458_v18 = vpop.xlane.xlu1 %457 }
 0x54a   : > { %v469_v1 = vadd.f32 %v465_v4, %v461_v5  ;;  %v468_v13 = vadd.f32 %v464_v11, %v458_v18 }
 0x54c   : > { %2647 = vperm.xlu0 %2945, %v469_v1   ;;  %2642 = vperm.xlu1 %2946, %v468_v13  }
 0x54d   : > { %v2066_v32 = vpop.permute.xlu1 %2065 }
 0x551   : > { %v2600_v26 = vpop.permute.xlu0 %2599  ;;  %v2622_v33 = vpop.permute.xlu1 %2621 }
 0x552   : > { %v2627_v37 = vrot.slane %v2622_v33, %v444_v43 }
 0x55a   : > { %v2589_v15 = vpop.f32.mrb[2].mxu1 }
 0x55b   : > { %v2591_v19 = vpop.f32.mrb[3].mxu1  ;;  %v2898_v24 = vadd.f32 %v2589_v15, %v2066_v32 }
 0x55c   : > { %v2899_v48 = vadd.f32 %v2591_v19, %v2066_v32 }
 0x55d   : > { %v2594_v23 = vmax.f32 %v2898_v24, 0.0 }
 0x55e   : > { %v2595_v25 = vmax.f32 %v2899_v48, 0.0 }
 0x55f   : > { %v2602_v27 = vmul.f32 %v2600_v26, %v2594_v23 }
 0x560   : > { %v2603_v28 = vmul.f32 %v2600_v26, %v2595_v25 }
 0x561   : > { %v2604_v2 = vsel %vm1026_vm1, %v2602_v27, 0.0 }
 0x562   : > { %v2611_v39 = vsel %vm1026_vm1, %v2603_v28, 0.0  ;;  %v2605_v30 = vrot.slane %v2604_v2, 4 }
 0x563   : > { %v2612_v8 = vrot.slane %v2611_v39, 4 }
 0x564   : > { %v2606_v10 = vadd.f32 %v2605_v30, %v2604_v2 }
 0x565   : > { %v2613_v16 = vadd.f32 %v2612_v8, %v2611_v39 }
 0x566   : > { %v2607_v21 = vrot.slane %v2606_v10, 2 }
 0x567   : > { %v2614_v31 = vrot.slane %v2613_v16, 2 }
 0x568   : > { %v2608_v17 = vadd.f32 %v2607_v21, %v2606_v10 }
 0x569   : > { %v2615_v22 = vadd.f32 %v2614_v31, %v2613_v16 }
 0x56a   : > { %v2609_v9 = vrot.slane %v2608_v17, 1 }
 0x56b   : > { %v2616_v14 = vrot.slane %v2615_v22, 1 }
 0x56c   : > { %v2610_v62 = vadd.f32 %v2609_v9, %v2608_v17 }
 0x56d   : > { %v2617_v34 = vadd.f32 %v2616_v14, %v2615_v22 }
 0x56e   : > { %v2628_v38 = vadd.f32 %v2627_v37, %v2610_v62 }
 0x56f   : > { %v2629_v57 = vadd.f32 %v2627_v37, %v2617_v34 }
 0x5c7   : > { %v2638_v20 = vpop.permute.xlu0 %2637  ;;  %v2633_v29 = vpop.permute.xlu1 %2632 }
 0x5c8   : > { %v2652_v35 = vmul.f32 %v2638_v20, %v2628_v38  ;;  %v2653_v40 = vmul.f32 %v2638_v20, %v2629_v57  ;;  %v2650_v42 = vmul.f32 %v2633_v29, %v2628_v38  ;;  %v2651_v44 = vmul.f32 %v2633_v29, %v2629_v57 }
 0x5ca   : > { %v2786_v45 = vmul.f32 -1.442695, %v2652_v35  ;;  %v2787_v46 = vmul.f32 -1.442695, %v2653_v40  ;;  %v2784_v47 = vmul.f32 -1.442695, %v2650_v42 }
 0x5cb   : > { %v2785_v50 = vmul.f32 -1.442695, %v2651_v44  ;;  %v2648_v51 = vpop.permute.xlu0 %2647  ;;  %v2643_v41 = vpop.permute.xlu1 %2642 }
 0x5cc   : > { %2955 = vpow2.f32 %v2786_v45  ;;  %v2656_v12 = vmul.f32 %v2648_v51, %v2628_v38  ;;  %v2657_v49 = vmul.f32 %v2648_v51, %v2629_v57  ;;  %v2654_v52 = vmul.f32 %v2643_v41, %v2628_v38 }
 0x5cd   : > { %2957 = vpow2.f32 %v2787_v46  ;;  %v2655_v6 = vmul.f32 %v2643_v41, %v2629_v57 }
 0x5ce   : > { %2959 = vpow2.f32 %v2784_v47  ;;  %v2790_v43 = vmul.f32 -1.442695, %v2656_v12  ;;  %v2791_v53 = vmul.f32 -1.442695, %v2657_v49  ;;  %v2788_v54 = vmul.f32 -1.442695, %v2654_v52 }
 0x5cf   : > { %2961 = vpow2.f32 %v2785_v50  ;;  %v2789_v55 = vmul.f32 -1.442695, %v2655_v6 }
 0x5d0   : > { %2963 = vpow2.f32 %v2790_v43 }
 0x5d1   : > { %2965 = vpow2.f32 %v2791_v53 }
 0x5d2   : > { %2967 = vpow2.f32 %v2788_v54 }
 0x5d3   : > { %2969 = vpow2.f32 %v2789_v55 }
 0x5d6   : > { %v2956_v36 = vpop.eup %2955 }
 0x5d7   : > { %v2958_v56 = vpop.eup %2957  ;;  %v2684_v58 = vadd.f32 1.0, %v2956_v36 }
 0x5d8   : > { %v2960_v59 = vpop.eup %2959  ;;  %v2685_v60 = vadd.f32 1.0, %v2958_v56 }
 0x5d9   : > { %v2962_v61 = vpop.eup %2961  ;;  %2971 = vrcp.f32 %v2684_v58  ;;  %v2682_v63 = vadd.f32 1.0, %v2960_v59 }
 0x5da   : > { %v2964_v0 = vpop.eup %2963  ;;  %2973 = vrcp.f32 %v2685_v60  ;;  %v2683_v7 = vadd.f32 1.0, %v2962_v61 }
 0x5db   : > { %v2966_v3 = vpop.eup %2965  ;;  %2975 = vrcp.f32 %v2682_v63  ;;  %v2688_v4 = vadd.f32 1.0, %v2964_v0 }
 0x5dc   : > { %v2968_v11 = vpop.eup %2967  ;;  %2977 = vrcp.f32 %v2683_v7  ;;  %v2689_v5 = vadd.f32 1.0, %v2966_v3 }
 0x5dd   : > { %v2970_v18 = vpop.eup %2969  ;;  %2979 = vrcp.f32 %v2688_v4  ;;  %v2686_v1 = vadd.f32 1.0, %v2968_v11 }
 0x5de   : > { %2981 = vrcp.f32 %v2689_v5  ;;  %v2687_v13 = vadd.f32 1.0, %v2970_v18 }
 0x5df   : > { %2983 = vrcp.f32 %v2686_v1 }
 0x5e0   : > { %2985 = vrcp.f32 %v2687_v13 }
 0x5e3   : > { %v2972_v15 = vpop.eup %2971 }
 0x5e4   : > { %v2974_v19 = vpop.eup %2973  ;;  %2708 = vst [vmem:[%s388_s21 + $0x10] sm:$0xff] %v2972_v15 }
 0x5e5   : > { %v2976_v32 = vpop.eup %2975  ;;  %2709 = vst [vmem:[%s388_s21 + $0x18] sm:$0xff] %v2974_v19 }
 0x5e6   : > { %v2978_v24 = vpop.eup %2977  ;;  %2706 = vst [vmem:[%s388_s21] sm:$0xff] %v2976_v32 }
 0x5e7   : > { %v2980_v48 = vpop.eup %2979  ;;  %2707 = vst [vmem:[%s388_s21 + $0x8] sm:$0xff] %v2978_v24 }
 0x5e8   : > { %v2982_v23 = vpop.eup %2981  ;;  %2712 = vst [vmem:[%s388_s21 + $0x30] sm:$0xff] %v2980_v48 }
 0x5e9   : > { %v2984_v25 = vpop.eup %2983  ;;  %2713 = vst [vmem:[%s388_s21 + $0x38] sm:$0xff] %v2982_v23 }
 0x5ea   : > { %v2986_v26 = vpop.eup %2985  ;;  %2710 = vst [vmem:[%s388_s21 + $0x20] sm:$0xff] %v2984_v25 }
 0x5eb   : > { %2711 = vst [vmem:[%s388_s21 + $0x28] sm:$0xff] %v2986_v26 }
 0x5ec PF: > { %s23_s19 = sadd.s32 1, %s2993_s19  }
 0x5ed   : > { %p20_p4 = scmp.ge.s32.totalorder %s23_s19, 4  }
 0x5ef   :  { %22 = sbr.rel (!%p20_p4) target bundleno = 3 (0x3), region = 96 }

</bundles_post_ra>
